<compile_context>
chip_gen: v5e
topology: v5e:2x2
jax: 0.10.0
libtpu: 0.0.40
codegen_flags: <defaults>
</compile_context>

<pallas_src>
import numpy as np
import jax
import jax.numpy as jnp
from jax.experimental import pallas as pl
from jax.experimental.pallas import tpu as pltpu

# ------------------------------------------------------------------ config --
E = 128            # embedding dim
H = 128            # GRU hidden dim
V = 128            # vocab size (both languages, synthetic)
SOS = 1            # '[sos]'
EOS = 2            # '[eos]'
MAX_DEC_STEPS = 100
T_SRC = 8          # source sentence length (tokens)
T_DEC_MAX = 128    # >= MAX_DEC_STEPS + 1, lane-aligned token buffer


# ------------------------------------------------------------------ kernel --
def _seq2seq_kernel(src_len_ref, x_src_ref,
                    enc_wih_ref, enc_whh_ref, enc_bih_ref, enc_bhh_ref,
                    dec_emb_ref, dec_wih_ref, dec_whh_ref, dec_bih_ref,
                    dec_bhh_ref, dec_wout_ref, dec_bout_ref,
                    tok_ref,                 # out: (1, T_DEC_MAX) int32
                    gi_enc_ref, gi_dec_ref): # scratch
    f32 = jnp.float32

    def gru_cell(gi, gh, h):
        # PyTorch GRU gate order (r, z, n); h' = (1-z)*n + z*h
        r = jax.nn.sigmoid(gi[:, 0:H] + gh[:, 0:H])
        z = jax.nn.sigmoid(gi[:, H:2 * H] + gh[:, H:2 * H])
        n = jnp.tanh(gi[:, 2 * H:3 * H] + r * gh[:, 2 * H:3 * H])
        return (1.0 - z) * n + z * h

    # -------------------------------------------------------------- encoder --
    # Hoisted input-side gate matmul: one (T_src_pad, E) @ (E, 3H) MXU matmul.
    gi_enc_ref[...] = (
        jnp.dot(x_src_ref[...], enc_wih_ref[...], preferred_element_type=f32)
        + enc_bih_ref[...])
    enc_whh = enc_whh_ref[...]
    enc_bhh = enc_bhh_ref[...]

    def enc_step(t, h):
        gi = gi_enc_ref[pl.ds(t, 1), :]                                 # (1,3H)
        gh = jnp.dot(h, enc_whh, preferred_element_type=f32) + enc_bhh  # (1,3H)
        return gru_cell(gi, gh, h)

    h_enc = jax.lax.fori_loop(0, src_len_ref[0], enc_step,
                              jnp.zeros((1, H), f32))

    # -------------------------------------------------------------- decoder --
    dec_emb = dec_emb_ref[...]
    dec_wih = dec_wih_ref[...]
    dec_whh = dec_whh_ref[...]
    dec_bih = dec_bih_ref[...]
    dec_bhh = dec_bhh_ref[...]
    dec_wout = dec_wout_ref[...]
    dec_bout = dec_bout_ref[...]

    # Cache the input-side gate pre-activation (GI row) of the [sos] token.
    x_sos = dec_emb_ref[pl.ds(SOS, 1), :]                               # (1, E)
    gi_dec_ref[0] = (jnp.dot(x_sos, dec_wih, preferred_element_type=f32)
                     + dec_bih)

    lane_v = jax.lax.broadcasted_iota(jnp.int32, (1, V), 1)
    lane_t = jax.lax.broadcasted_iota(jnp.int32, (1, T_DEC_MAX), 1)
    tok0 = jnp.where(lane_t == 0, SOS, 0).astype(jnp.int32)    # (1, T_DEC_MAX)

    def prefix_step(t, hh):
        gi = gi_dec_ref[t]                                              # (1,3H)
        gh = jnp.dot(hh, dec_whh, preferred_element_type=f32) + dec_bhh
        return gru_cell(gi, gh, hh)

    def dec_step(i, carry):
        hh, toks = carry
        # Re-run the decoder GRU over the full prefix (length i+1) from the
        # *current* hidden state -- exactly what the reference does.
        h_new = jax.lax.fori_loop(0, i + 1, prefix_step, hh)
        logits = (jnp.dot(h_new, dec_wout, preferred_element_type=f32)
                  + dec_bout)                                           # (1, V)
        m = jnp.max(logits, axis=1, keepdims=True)                      # (1, 1)
        nxt = jnp.min(jnp.where(logits == m, lane_v, V), axis=1,
                      keepdims=True).astype(jnp.int32)        # (1,1) first argmax
        # Record token i+1 in the carried token row (pure vector update).
        toks = jnp.where(lane_t == (i + 1), nxt, toks)
        # Embed the new token via a one-hot matmul and cache its GI row so the
        # next prefix re-decode only needs the h @ Whh GEMV per step.
        onehot = (lane_v == nxt).astype(f32)                            # (1, V)
        x_new = jnp.dot(onehot, dec_emb, preferred_element_type=f32)    # (1, E)
        gi_dec_ref[i + 1] = (jnp.dot(x_new, dec_wih,
                                     preferred_element_type=f32) + dec_bih)
        return h_new, toks

    _, toks = jax.lax.fori_loop(0, MAX_DEC_STEPS, dec_step, (h_enc, tok0))
    tok_ref[...] = toks


# ---------------------------------------------------------------- wrappers --
_VMEM = pl.BlockSpec(memory_space=pltpu.MemorySpace.VMEM)
_SMEM = pl.BlockSpec(memory_space=pltpu.MemorySpace.SMEM)


@jax.jit
def seq2seq_decode(params, src_ids):
    """Run the whole encode + greedy-decode forward pass in one pallas_call.

    Returns a (1, T_DEC_MAX) int32 token row: [sos] followed by 100 decoded
    tokens (the host truncates at the first [eos]).
    """
    t_src = src_ids.shape[0]
    t_pad = ((t_src + 7) // 8) * 8
    x_src = jnp.take(params["enc_emb"], src_ids, axis=0)          # (T_SRC, E)
    x_src = jnp.pad(x_src, ((0, t_pad - t_src), (0, 0)))
    src_len = jnp.full((1,), t_src, jnp.int32)

    return pl.pallas_call(
        _seq2seq_kernel,
        out_shape=jax.ShapeDtypeStruct((1, T_DEC_MAX), jnp.int32),
        in_specs=[_SMEM] + [_VMEM] * 12,
        out_specs=_VMEM,
        scratch_shapes=[
            pltpu.VMEM((t_pad, 3 * H), jnp.float32),        # encoder GI rows
            pltpu.VMEM((T_DEC_MAX, 1, 3 * H), jnp.float32), # decoder GI cache
        ],
    )(src_len, x_src,
      params["enc_wih"], params["enc_whh"], params["enc_bih"], params["enc_bhh"],
      params["dec_emb"], params["dec_wih"], params["dec_whh"],
      params["dec_bih"], params["dec_bhh"],
      params["dec_wout"], params["dec_bout"])


# ------------------------------------------------------------- parameters --
def init_params(key):
    ks = jax.random.split(key, 10)
    s = 0.1
    return {
        # encoder
        "enc_emb": jax.random.normal(ks[0], (V, E), jnp.float32) * s,
        "enc_wih": jax.random.normal(ks[1], (E, 3 * H), jnp.float32) * s,
        "enc_whh": jax.random.normal(ks[2], (H, 3 * H), jnp.float32) * s,
        "enc_bih": jax.random.normal(ks[3], (1, 3 * H), jnp.float32) * s,
        "enc_bhh": jax.random.normal(ks[4], (1, 3 * H), jnp.float32) * s,
        # decoder
        "dec_emb": jax.random.normal(ks[5], (V, E), jnp.float32) * s,
        "dec_wih": jax.random.normal(ks[6], (E, 3 * H), jnp.float32) * s,
        "dec_whh": jax.random.normal(ks[7], (H, 3 * H), jnp.float32) * s,
        "dec_bih": jnp.zeros((1, 3 * H), jnp.float32),
        "dec_bhh": jnp.zeros((1, 3 * H), jnp.float32),
        "dec_wout": jax.random.normal(ks[8], (H, V), jnp.float32) * s,
        "dec_bout": jax.random.normal(ks[9], (1, V), jnp.float32) * s,
    }


# synthetic French vocab: what w.getFraWord would return
def get_fra_word(i):
    if i == SOS:
        return "[sos]"
    if i == EOS:
        return "[eos]"
    return f"tok{i}"


# ----------------------------------------------------------- forward pass --
def eval_model_forward(params, src_ids):
    """Mirror of EvalModel.forward, on integer source token ids."""
    tokens = seq2seq_decode(params, src_ids)      # single fused kernel launch
    jax.block_until_ready(tokens)
    tok_row = np.asarray(jax.device_get(tokens))[0]

    # Host-side string glue (same early-stop rule as the reference loop):
    out_ids = [int(tok_row[0])]                   # [sos]
    for j in range(1, MAX_DEC_STEPS + 1):
        out_ids.append(int(tok_row[j]))
        if out_ids[-1] == EOS:
            break
    return " ".join(get_fra_word(i) for i in out_ids)


# ----------------------------------------------------------------- driver --
if __name__ == "__main__":
    key = jax.random.PRNGKey(0)
    pkey, dkey = jax.random.split(key)
    params = init_params(pkey)

    # synthetic "English sentence": token ids (what the tokenizer + w.getEngIndex
    # would produce), avoiding the reserved sos/eos/pad ids.
    src_ids = jax.random.randint(dkey, (T_SRC,), 3, V, dtype=jnp.int32)

    sentence = eval_model_forward(params, src_ids)
    assert isinstance(sentence, str) and sentence.startswith("[sos]")
    print("KERNEL_OK")
</pallas_src>

<mosaic_0001>
module attributes {stable_mosaic.version = 11 : i64} {
  func.func @_seq2seq_kernel(%arg0: memref<1xi32, #tpu.memory_space<smem>>, %arg1: memref<8x128xf32, #tpu.memory_space<vmem>>, %arg2: memref<128x384xf32, #tpu.memory_space<vmem>>, %arg3: memref<128x384xf32, #tpu.memory_space<vmem>>, %arg4: memref<1x384xf32, #tpu.memory_space<vmem>>, %arg5: memref<1x384xf32, #tpu.memory_space<vmem>>, %arg6: memref<128x128xf32, #tpu.memory_space<vmem>>, %arg7: memref<128x384xf32, #tpu.memory_space<vmem>>, %arg8: memref<128x384xf32, #tpu.memory_space<vmem>>, %arg9: memref<1x384xf32, #tpu.memory_space<vmem>>, %arg10: memref<1x384xf32, #tpu.memory_space<vmem>>, %arg11: memref<128x128xf32, #tpu.memory_space<vmem>>, %arg12: memref<1x128xf32, #tpu.memory_space<vmem>>, %arg13: memref<1x128xi32, #tpu.memory_space<vmem>>, %arg14: memref<8x384xf32, #tpu.memory_space<vmem>>, %arg15: memref<128x1x384xf32, #tpu.memory_space<vmem>>) attributes {dimension_semantics = [], scalar_prefetch = 0 : i64, scratch_operands = 2 : i64, tpu.core_type = #tpu.core_type<tc>} {
    %c0 = arith.constant 0 : index
    %c0_0 = arith.constant 0 : index
    %0 = vector.load %arg1[%c0, %c0_0] : memref<8x128xf32, #tpu.memory_space<vmem>>, vector<8x128xf32>
    %c0_1 = arith.constant 0 : index
    %c0_2 = arith.constant 0 : index
    %1 = vector.load %arg2[%c0_1, %c0_2] : memref<128x384xf32, #tpu.memory_space<vmem>>, vector<128x384xf32>
    %cst = arith.constant dense<0.000000e+00> : vector<8x384xf32>
    %2 = tpu.matmul %0, %1, %cst {dimension_numbers = #tpu.dot_dimension_numbers<[1], [0], [0], [1], [0, 0, 1, 1], [], []>} : vector<8x128xf32>, vector<128x384xf32>, vector<8x384xf32> -> vector<8x384xf32>
    %c0_3 = arith.constant 0 : index
    %c0_4 = arith.constant 0 : index
    %3 = vector.load %arg4[%c0_3, %c0_4] : memref<1x384xf32, #tpu.memory_space<vmem>>, vector<1x384xf32>
    %4 = vector.broadcast %3 : vector<1x384xf32> to vector<8x384xf32>
    %5 = arith.addf %2, %4 : vector<8x384xf32>
    %c0_5 = arith.constant 0 : index
    %c0_6 = arith.constant 0 : index
    %6 = vector.load %arg14[%c0_5, %c0_6] : memref<8x384xf32, #tpu.memory_space<vmem>>, vector<8x384xf32>
    tpu.vector_store %arg14[%c0_5, %c0_6], %5 {strides = array<i32>} : memref<8x384xf32, #tpu.memory_space<vmem>>, vector<8x384xf32>,
    %c0_7 = arith.constant 0 : index
    %c0_8 = arith.constant 0 : index
    %7 = vector.load %arg3[%c0_7, %c0_8] : memref<128x384xf32, #tpu.memory_space<vmem>>, vector<128x384xf32>
    %c0_9 = arith.constant 0 : index
    %c0_10 = arith.constant 0 : index
    %8 = vector.load %arg5[%c0_9, %c0_10] : memref<1x384xf32, #tpu.memory_space<vmem>>, vector<1x384xf32>
    %c0_11 = arith.constant 0 : index
    %9 = memref.load %arg0[%c0_11] : memref<1xi32, #tpu.memory_space<smem>>
    %cst_12 = arith.constant 0.000000e+00 : f32
    %10 = vector.broadcast %cst_12 : f32 to vector<1x128xf32>
    %c0_i32 = arith.constant 0 : i32
    %11 = arith.subi %9, %c0_i32 : i32
    %12 = arith.addi %c0_i32, %11 : i32
    %c1_i32 = arith.constant 1 : i32
    %13 = scf.for %arg16 = %c0_i32 to %12 step %c1_i32 iter_args(%arg17 = %10) -> (vector<1x128xf32>)  : i32 {
      %37 = arith.index_cast %arg16 : i32 to index
      %c0_40 = arith.constant 0 : index
      %38 = vector.load %arg14[%37, %c0_40] : memref<8x384xf32, #tpu.memory_space<vmem>>, vector<1x384xf32>
      %cst_41 = arith.constant dense<0.000000e+00> : vector<1x384xf32>
      %39 = tpu.matmul %arg17, %7, %cst_41 {dimension_numbers = #tpu.dot_dimension_numbers<[1], [0], [0], [1], [0, 0, 1, 1], [], []>} : vector<1x128xf32>, vector<128x384xf32>, vector<1x384xf32> -> vector<1x384xf32>
      %40 = arith.addf %39, %8 : vector<1x384xf32>
      %41 = vector.extract_strided_slice %38 {offsets = [0, 0], sizes = [1, 128], strides = [1, 1]} : vector<1x384xf32> to vector<1x128xf32>
      %42 = vector.extract_strided_slice %40 {offsets = [0, 0], sizes = [1, 128], strides = [1, 1]} : vector<1x384xf32> to vector<1x128xf32>
      %43 = arith.addf %41, %42 : vector<1x128xf32>
      %44 = arith.negf %43 : vector<1x128xf32>
      %45 = math.exp %44 : vector<1x128xf32>
      %cst_42 = arith.constant 1.000000e+00 : f32
      %46 = vector.broadcast %cst_42 : f32 to vector<1x128xf32>
      %47 = arith.addf %46, %45 : vector<1x128xf32>
      %48 = arith.divf %46, %47 : vector<1x128xf32>
      %49 = vector.extract_strided_slice %38 {offsets = [0, 128], sizes = [1, 128], strides = [1, 1]} : vector<1x384xf32> to vector<1x128xf32>
      %50 = vector.extract_strided_slice %40 {offsets = [0, 128], sizes = [1, 128], strides = [1, 1]} : vector<1x384xf32> to vector<1x128xf32>
      %51 = arith.addf %49, %50 : vector<1x128xf32>
      %52 = arith.negf %51 : vector<1x128xf32>
      %53 = math.exp %52 : vector<1x128xf32>
      %cst_43 = arith.constant 1.000000e+00 : f32
      %54 = vector.broadcast %cst_43 : f32 to vector<1x128xf32>
      %55 = arith.addf %54, %53 : vector<1x128xf32>
      %56 = arith.divf %54, %55 : vector<1x128xf32>
      %57 = vector.extract_strided_slice %38 {offsets = [0, 256], sizes = [1, 128], strides = [1, 1]} : vector<1x384xf32> to vector<1x128xf32>
      %58 = vector.extract_strided_slice %40 {offsets = [0, 256], sizes = [1, 128], strides = [1, 1]} : vector<1x384xf32> to vector<1x128xf32>
      %59 = arith.mulf %48, %58 : vector<1x128xf32>
      %60 = arith.addf %57, %59 : vector<1x128xf32>
      %61 = math.tanh %60 : vector<1x128xf32>
      %cst_44 = arith.constant 1.000000e+00 : f32
      %62 = vector.broadcast %cst_44 : f32 to vector<1x128xf32>
      %63 = arith.subf %62, %56 : vector<1x128xf32>
      %64 = arith.mulf %63, %61 : vector<1x128xf32>
      %65 = arith.mulf %56, %arg17 : vector<1x128xf32>
      %66 = arith.addf %64, %65 : vector<1x128xf32>
      scf.yield %66 : vector<1x128xf32>
    }
    %c0_13 = arith.constant 0 : index
    %c0_14 = arith.constant 0 : index
    %14 = vector.load %arg6[%c0_13, %c0_14] : memref<128x128xf32, #tpu.memory_space<vmem>>, vector<128x128xf32>
    %c0_15 = arith.constant 0 : index
    %c0_16 = arith.constant 0 : index
    %15 = vector.load %arg7[%c0_15, %c0_16] : memref<128x384xf32, #tpu.memory_space<vmem>>, vector<128x384xf32>
    %c0_17 = arith.constant 0 : index
    %c0_18 = arith.constant 0 : index
    %16 = vector.load %arg8[%c0_17, %c0_18] : memref<128x384xf32, #tpu.memory_space<vmem>>, vector<128x384xf32>
    %c0_19 = arith.constant 0 : index
    %c0_20 = arith.constant 0 : index
    %17 = vector.load %arg9[%c0_19, %c0_20] : memref<1x384xf32, #tpu.memory_space<vmem>>, vector<1x384xf32>
    %c0_21 = arith.constant 0 : index
    %c0_22 = arith.constant 0 : index
    %18 = vector.load %arg10[%c0_21, %c0_22] : memref<1x384xf32, #tpu.memory_space<vmem>>, vector<1x384xf32>
    %c0_23 = arith.constant 0 : index
    %c0_24 = arith.constant 0 : index
    %19 = vector.load %arg11[%c0_23, %c0_24] : memref<128x128xf32, #tpu.memory_space<vmem>>, vector<128x128xf32>
    %c0_25 = arith.constant 0 : index
    %c0_26 = arith.constant 0 : index
    %20 = vector.load %arg12[%c0_25, %c0_26] : memref<1x128xf32, #tpu.memory_space<vmem>>, vector<1x128xf32>
    %c1 = arith.constant 1 : index
    %c0_27 = arith.constant 0 : index
    %21 = vector.load %arg6[%c1, %c0_27] : memref<128x128xf32, #tpu.memory_space<vmem>>, vector<1x128xf32>
    %cst_28 = arith.constant dense<0.000000e+00> : vector<1x384xf32>
    %22 = tpu.matmul %21, %15, %cst_28 {dimension_numbers = #tpu.dot_dimension_numbers<[1], [0], [0], [1], [0, 0, 1, 1], [], []>} : vector<1x128xf32>, vector<128x384xf32>, vector<1x384xf32> -> vector<1x384xf32>
    %23 = arith.addf %22, %17 : vector<1x384xf32>
    %c0_29 = arith.constant 0 : index
    %c0_30 = arith.constant 0 : index
    %c0_31 = arith.constant 0 : index
    %24 = vector.load %arg15[%c0_29, %c0_30, %c0_31] : memref<128x1x384xf32, #tpu.memory_space<vmem>>, vector<1x1x384xf32>
    %25 = vector.shape_cast %24 : vector<1x1x384xf32> to vector<1x384xf32>
    %26 = vector.shape_cast %23 : vector<1x384xf32> to vector<1x1x384xf32>
    tpu.vector_store %arg15[%c0_29, %c0_30, %c0_31], %26 {strides = array<i32>} : memref<128x1x384xf32, #tpu.memory_space<vmem>>, vector<1x1x384xf32>,
    %27 = tpu.iota {dimensions = array<i32: 1>} : vector<1x128xi32>
    %28 = tpu.iota {dimensions = array<i32: 1>} : vector<1x128xi32>
    %c0_i32_32 = arith.constant 0 : i32
    %29 = vector.broadcast %c0_i32_32 : i32 to vector<1x128xi32>
    %30 = arith.cmpi eq, %28, %29 : vector<1x128xi32>
    %c1_i32_33 = arith.constant 1 : i32
    %c0_i32_34 = arith.constant 0 : i32
    %31 = vector.broadcast %c1_i32_33 : i32 to vector<1x128xi32>
    %32 = vector.broadcast %c0_i32_34 : i32 to vector<1x128xi32>
    %33 = arith.select %30, %31, %32 : vector<1x128xi1>, vector<1x128xi32>
    %c0_i32_35 = arith.constant 0 : i32
    %c100_i32 = arith.constant 100 : i32
    %34 = arith.addi %c0_i32_35, %c100_i32 : i32
    %c1_i32_36 = arith.constant 1 : i32
    %35:2 = scf.for %arg16 = %c0_i32_35 to %34 step %c1_i32_36 iter_args(%arg17 = %13, %arg18 = %33) -> (vector<1x128xf32>, vector<1x128xi32>)  : i32 {
      %c1_i32_40 = arith.constant 1 : i32
      %37 = arith.addi %arg16, %c1_i32_40 : i32
      %c0_i32_41 = arith.constant 0 : i32
      %38 = arith.subi %37, %c0_i32_41 : i32
      %39 = arith.addi %c0_i32_41, %38 : i32
      %c1_i32_42 = arith.constant 1 : i32
      %40 = scf.for %arg19 = %c0_i32_41 to %39 step %c1_i32_42 iter_args(%arg20 = %arg17) -> (vector<1x128xf32>)  : i32 {
        %69 = arith.index_cast %arg19 : i32 to index
        %c0_52 = arith.constant 0 : index
        %c0_53 = arith.constant 0 : index
        %70 = vector.load %arg15[%69, %c0_52, %c0_53] : memref<128x1x384xf32, #tpu.memory_space<vmem>>, vector<1x1x384xf32>
        %71 = vector.shape_cast %70 : vector<1x1x384xf32> to vector<1x384xf32>
        %cst_54 = arith.constant dense<0.000000e+00> : vector<1x384xf32>
        %72 = tpu.matmul %arg20, %16, %cst_54 {dimension_numbers = #tpu.dot_dimension_numbers<[1], [0], [0], [1], [0, 0, 1, 1], [], []>} : vector<1x128xf32>, vector<128x384xf32>, vector<1x384xf32> -> vector<1x384xf32>
        %73 = arith.addf %72, %18 : vector<1x384xf32>
        %74 = vector.extract_strided_slice %71 {offsets = [0, 0], sizes = [1, 128], strides = [1, 1]} : vector<1x384xf32> to vector<1x128xf32>
        %75 = vector.extract_strided_slice %73 {offsets = [0, 0], sizes = [1, 128], strides = [1, 1]} : vector<1x384xf32> to vector<1x128xf32>
        %76 = arith.addf %74, %75 : vector<1x128xf32>
        %77 = arith.negf %76 : vector<1x128xf32>
        %78 = math.exp %77 : vector<1x128xf32>
        %cst_55 = arith.constant 1.000000e+00 : f32
        %79 = vector.broadcast %cst_55 : f32 to vector<1x128xf32>
        %80 = arith.addf %79, %78 : vector<1x128xf32>
        %81 = arith.divf %79, %80 : vector<1x128xf32>
        %82 = vector.extract_strided_slice %71 {offsets = [0, 128], sizes = [1, 128], strides = [1, 1]} : vector<1x384xf32> to vector<1x128xf32>
        %83 = vector.extract_strided_slice %73 {offsets = [0, 128], sizes = [1, 128], strides = [1, 1]} : vector<1x384xf32> to vector<1x128xf32>
        %84 = arith.addf %82, %83 : vector<1x128xf32>
        %85 = arith.negf %84 : vector<1x128xf32>
        %86 = math.exp %85 : vector<1x128xf32>
        %cst_56 = arith.constant 1.000000e+00 : f32
        %87 = vector.broadcast %cst_56 : f32 to vector<1x128xf32>
        %88 = arith.addf %87, %86 : vector<1x128xf32>
        %89 = arith.divf %87, %88 : vector<1x128xf32>
        %90 = vector.extract_strided_slice %71 {offsets = [0, 256], sizes = [1, 128], strides = [1, 1]} : vector<1x384xf32> to vector<1x128xf32>
        %91 = vector.extract_strided_slice %73 {offsets = [0, 256], sizes = [1, 128], strides = [1, 1]} : vector<1x384xf32> to vector<1x128xf32>
        %92 = arith.mulf %81, %91 : vector<1x128xf32>
        %93 = arith.addf %90, %92 : vector<1x128xf32>
        %94 = math.tanh %93 : vector<1x128xf32>
        %cst_57 = arith.constant 1.000000e+00 : f32
        %95 = vector.broadcast %cst_57 : f32 to vector<1x128xf32>
        %96 = arith.subf %95, %89 : vector<1x128xf32>
        %97 = arith.mulf %96, %94 : vector<1x128xf32>
        %98 = arith.mulf %89, %arg20 : vector<1x128xf32>
        %99 = arith.addf %97, %98 : vector<1x128xf32>
        scf.yield %99 : vector<1x128xf32>
      }
      %cst_43 = arith.constant dense<0.000000e+00> : vector<1x128xf32>
      %41 = tpu.matmul %40, %19, %cst_43 {dimension_numbers = #tpu.dot_dimension_numbers<[1], [0], [0], [1], [0, 0, 1, 1], [], []>} : vector<1x128xf32>, vector<128x128xf32>, vector<1x128xf32> -> vector<1x128xf32>
      %42 = arith.addf %41, %20 : vector<1x128xf32>
      %cst_44 = arith.constant dense<0xFF800000> : vector<1xf32>
      %43 = vector.multi_reduction <maximumf>, %42, %cst_44 [1] : vector<1x128xf32> to vector<1xf32>
      %44 = vector.shape_cast %43 : vector<1xf32> to vector<1x1xf32>
      %45 = vector.broadcast %44 : vector<1x1xf32> to vector<1x128xf32>
      %46 = arith.cmpf oeq, %42, %45 : vector<1x128xf32>
      %c128_i32 = arith.constant 128 : i32
      %47 = vector.broadcast %c128_i32 : i32 to vector<1x128xi32>
      %48 = arith.select %46, %27, %47 : vector<1x128xi1>, vector<1x128xi32>
      %cst_45 = arith.constant dense<2147483647> : vector<1xi32>
      %49 = vector.multi_reduction <minsi>, %48, %cst_45 [1] : vector<1x128xi32> to vector<1xi32>
      %50 = vector.shape_cast %49 : vector<1xi32> to vector<1x1xi32>
      %c1_i32_46 = arith.constant 1 : i32
      %51 = arith.addi %arg16, %c1_i32_46 : i32
      %52 = vector.broadcast %51 : i32 to vector<1x128xi32>
      %53 = arith.cmpi eq, %28, %52 : vector<1x128xi32>
      %54 = vector.shape_cast %50 : vector<1x1xi32> to vector<1x1xi32>
      %55 = vector.broadcast %54 : vector<1x1xi32> to vector<1x128xi32>
      %56 = arith.select %53, %55, %arg18 : vector<1x128xi1>, vector<1x128xi32>
      %57 = vector.broadcast %50 : vector<1x1xi32> to vector<1x128xi32>
      %58 = arith.cmpi eq, %27, %57 : vector<1x128xi32>
      %59 = arith.extui %58 : vector<1x128xi1> to vector<1x128xi32>
      %60 = arith.sitofp %59 : vector<1x128xi32> to vector<1x128xf32>
      %cst_47 = arith.constant dense<0.000000e+00> : vector<1x128xf32>
      %61 = tpu.matmul %60, %14, %cst_47 {dimension_numbers = #tpu.dot_dimension_numbers<[1], [0], [0], [1], [0, 0, 1, 1], [], []>} : vector<1x128xf32>, vector<128x128xf32>, vector<1x128xf32> -> vector<1x128xf32>
      %cst_48 = arith.constant dense<0.000000e+00> : vector<1x384xf32>
      %62 = tpu.matmul %61, %15, %cst_48 {dimension_numbers = #tpu.dot_dimension_numbers<[1], [0], [0], [1], [0, 0, 1, 1], [], []>} : vector<1x128xf32>, vector<128x384xf32>, vector<1x384xf32> -> vector<1x384xf32>
      %63 = arith.addf %62, %17 : vector<1x384xf32>
      %c1_i32_49 = arith.constant 1 : i32
      %64 = arith.addi %arg16, %c1_i32_49 : i32
      %65 = arith.index_cast %64 : i32 to index
      %c0_50 = arith.constant 0 : index
      %c0_51 = arith.constant 0 : index
      %66 = vector.load %arg15[%65, %c0_50, %c0_51] : memref<128x1x384xf32, #tpu.memory_space<vmem>>, vector<1x1x384xf32>
      %67 = vector.shape_cast %66 : vector<1x1x384xf32> to vector<1x384xf32>
      %68 = vector.shape_cast %63 : vector<1x384xf32> to vector<1x1x384xf32>
      tpu.vector_store %arg15[%65, %c0_50, %c0_51], %68 {strides = array<i32>} : memref<128x1x384xf32, #tpu.memory_space<vmem>>, vector<1x1x384xf32>,
      scf.yield %40, %56 : vector<1x128xf32>, vector<1x128xi32>
    }
    %c100_i32_37 = arith.constant 100 : i32
    %c0_38 = arith.constant 0 : index
    %c0_39 = arith.constant 0 : index
    %36 = vector.load %arg13[%c0_38, %c0_39] : memref<1x128xi32, #tpu.memory_space<vmem>>, vector<1x128xi32>
    tpu.vector_store %arg13[%c0_38, %c0_39], %35#1 {strides = array<i32>} : memref<1x128xi32, #tpu.memory_space<vmem>>, vector<1x128xi32>,
    return
  }
}

</mosaic_0001>

<bundles_post_ra>
// kernel: seq2seq_decode.1
= control target key start
LH: loop header
LB: loop body
LE: loop exit
PB: predicated region body
PF: predicated region fallthrough
CT: control target
= control target key end

     0   :  { %19 = vsyncpa [#allocation6], 0  ;;  %s2212_s0 = inlined_call_operand.<no memory space> [shape: s32[1], index: 0, kind: input, shape index: {}]   ;;  %s2213_s1 = inlined_call_operand.vmem [shape: f32[8,128], index: 1, kind: input, shape index: {}]   ;;  %s2214_s2 = inlined_call_operand.hbm [shape: f32[128,384], index: 2, kind: input, shape index: {}]   ;;  %s2215_s3 = inlined_call_operand.hbm [shape: f32[128,384], index: 3, kind: input, shape index: {}]   ;;  %s2216_s4 = inlined_call_operand.vmem [shape: f32[1,384], index: 4, kind: input, shape index: {}]   ;;  %s2217_s5 = inlined_call_operand.vmem [shape: f32[1,384], index: 5, kind: input, shape index: {}]   ;;  %s2218_s6 = inlined_call_operand.hbm [shape: f32[128,128], index: 6, kind: input, shape index: {}]   ;;  %s2219_s7 = inlined_call_operand.hbm [shape: f32[128,384], index: 7, kind: input, shape index: {}]   ;;  %s2220_s8 = inlined_call_operand.hbm [shape: f32[128,384], index: 8, kind: input, shape index: {}]   ;;  %s2221_s9 = inlined_call_operand.vmem [shape: f32[1,384], index: 9, kind: input, shape index: {}]   ;;  %s2222_s10 = inlined_call_operand.vmem [shape: f32[1,384], index: 10, kind: input, shape index: {}]   ;;  %s2223_s11 = inlined_call_operand.hbm [shape: f32[128,128], index: 11, kind: input, shape index: {}]   ;;  %s2224_s12 = inlined_call_operand.vmem [shape: f32[1,128], index: 12, kind: input, shape index: {}]   ;;  %s2225_s13 = inlined_call_operand.hbm [shape: s32[1,128], index: 13, kind: output, shape index: {}]  }
   0x1   :  { %20 = vsyncpa [#allocation9], 0 }
   0x2   :  { %21 = vsyncpa [#allocation12], 0 }
   0x3   :  { %22 = vsyncpa [#allocation15], 0 }
   0x4   :  { %23 = vsyncpa [#allocation7], 0  ;;  %s45_s27 = sshll.u32 %s2215_s3, 4  ;;  %s1359_s28 = smov [#allocation8]   ;;  %s46_s27 = int_to_ptr.hbm [resolvable:$true] %s45_s27 }
   0x5   :  { %s47_s29 = sshll.u32 %s1359_s28, 4  ;;  %s75_s15 = sshll.u32 %s2219_s7, 4  ;;  %s48_s29 = int_to_ptr.vmem [resolvable:$true] %s47_s29  ;;  %s76_s15 = int_to_ptr.hbm [resolvable:$true] %s75_s15 }
   0x6   :  { %s1360_s16 = smov 384   ;;  %s1361_s17 = smov 24  }
   0x7   :  { %53 = dma.hbm_to_vmem [thread:$0]  %s46_s27, 6144, %s48_s29, [#allocation9], %s1360_s16, %s1360_s16, %s1361_s17  }
   0x8   :  { %s1362_s18 = smov [#allocation11]   ;;  %s32_s3 = sshll.u32 %s2214_s2, 4  ;;  %s33_s3 = int_to_ptr.hbm [resolvable:$true] %s32_s3 }
   0x9   :  { %s77_s19 = sshll.u32 %s1362_s18, 4  ;;  %s62_s23 = sshll.u32 %s2218_s6, 4  ;;  %s78_s19 = int_to_ptr.vmem [resolvable:$true] %s77_s19  ;;  %s63_s23 = int_to_ptr.hbm [resolvable:$true] %s62_s23 }
   0xa   :  { %83 = dma.hbm_to_vmem [thread:$0]  %s76_s15, 6144, %s78_s19, [#allocation12], %s1360_s16, %s1360_s16, %s1361_s17  }
   0xb   :  { %s1363_s24 = smov [#allocation5]   ;;  %s1364_s26 = smov [#allocation10]  }
   0xc   :  { %s34_s25 = sshll.u32 %s1363_s24, 4  ;;  %s64_s2 = sshll.u32 %s1364_s26, 4  ;;  %s35_s25 = int_to_ptr.vmem [resolvable:$true] %s34_s25  ;;  %s65_s2 = int_to_ptr.vmem [resolvable:$true] %s64_s2 }
   0xd   :  { %40 = dma.hbm_to_vmem [thread:$0]  %s33_s3, 6144, %s35_s25, [#allocation6], %s1360_s16, %s1360_s16, %s1361_s17  }
   0xe   :  { %s1365_s27 = smov 128   ;;  %s1366_s28 = smov 8  }
   0xf   :  { %70 = dma.hbm_to_vmem [thread:$0]  %s63_s23, 2048, %s65_s2, [#allocation9], %s1365_s27, %s1365_s27, %s1366_s28  }
  0x10   :  { %s88_s14 = sshll.u32 %s2220_s8, 4  ;;  %s1367_s6 = smov [#allocation13]   ;;  %s89_s14 = int_to_ptr.hbm [resolvable:$true] %s88_s14 }
  0x11   :  { %s90_s15 = sshll.u32 %s1367_s6, 4  ;;  %s105_s20 = sshll.u32 %s2223_s11, 4  ;;  %s91_s15 = int_to_ptr.vmem [resolvable:$true] %s90_s15  ;;  %s106_s20 = int_to_ptr.hbm [resolvable:$true] %s105_s20 }
  0x12   :  { %96 = dma.hbm_to_vmem [thread:$0]  %s89_s14, 6144, %s91_s15, [#allocation12], %s1360_s16, %s1360_s16, %s1361_s17  }
  0x13   :  { %s1368_s21 = smov [#allocation14]  }
  0x14   :  { %s107_s3 = sshll.u32 %s1368_s21, 4  ;;  %s108_s3 = int_to_ptr.vmem [resolvable:$true] %s107_s3 }
  0x15   :  { %113 = dma.hbm_to_vmem [thread:$0]  %s106_s20, 2048, %s108_s3, [#allocation15], %s1365_s27, %s1365_s27, %s1366_s28  }
  0x16   :  { %1313 = dma.done.wait [#allocation6], 6144  }
  0x17   :  { %1314 = vsyncadd [#allocation6], 4294961152 }
  0x18   :  { %1315 = dma.done.wait [#allocation9], 8192  }
  0x19   :  { %1316 = vsyncadd [#allocation9], 4294959104 }
  0x1a   :  { %1317 = dma.done.wait [#allocation12], 12288  }
  0x1b   :  { %1318 = vsyncadd [#allocation12], 4294955008 }
  0x1c   :  { %1319 = dma.done.wait [#allocation15], 2048  }
  0x1d   :  { %1320 = vsyncadd [#allocation15], 4294965248  ;;  %v1472_v0 = vld [vmem:[#allocation8] sm:$0xff]  ;;  %v1474_v1 = vld [vmem:[#allocation8 + $0x8] sm:$0xff]  ;;  %p994_p0 = scmp.le.s32.totalorder %s2212_s0, 0 }
  0x1e   :  { %2280 = vst [vmem:[#allocation22_spill] sm:$0xff] %v1472_v0  ;;  %v1476_v2 = vld [vmem:[#allocation8 + $0x10] sm:$0xff]  ;;  %v1478_v3 = vld [vmem:[#allocation8 + $0x18] sm:$0xff]  ;;  %v1480_v4 = vld [vmem:[#allocation8 + $0x20] sm:$0xff] }
  0x1f   :  { %2281 = vst [vmem:[#allocation23_spill] sm:$0xff] %v1474_v1  ;;  %v1482_v5 = vld [vmem:[#allocation8 + $0x28] sm:$0xff]  ;;  %v1484_v6 = vld [vmem:[#allocation8 + $0x30] sm:$0xff]  ;;  %v1486_v7 = vld [vmem:[#allocation8 + $0x38] sm:$0xff] }
  0x20   :  { %2282 = vst [vmem:[#allocation24_spill] sm:$0xff] %v1476_v2  ;;  %v1488_v8 = vld [vmem:[#allocation8 + $0x40] sm:$0xff]  ;;  %v1490_v9 = vld [vmem:[#allocation8 + $0x48] sm:$0xff]  ;;  %v1492_v10 = vld [vmem:[#allocation8 + $0x50] sm:$0xff] }
  0x21   :  { %2283 = vst [vmem:[#allocation25_spill] sm:$0xff] %v1478_v3  ;;  %v1494_v11 = vld [vmem:[#allocation8 + $0x58] sm:$0xff]  ;;  %v1496_v12 = vld [vmem:[#allocation8 + $0x60] sm:$0xff]  ;;  %v1498_v13 = vld [vmem:[#allocation8 + $0x68] sm:$0xff] }
  0x22   :  { %2284 = vst [vmem:[#allocation26_spill] sm:$0xff] %v1480_v4  ;;  %v1500_v14 = vld [vmem:[#allocation8 + $0x70] sm:$0xff]  ;;  %v1502_v15 = vld [vmem:[#allocation8 + $0x78] sm:$0xff]  ;;  %v1504_v16 = vld [vmem:[#allocation8 + $0x80] sm:$0xff] }
  0x23   :  { %2285 = vst [vmem:[#allocation27_spill] sm:$0xff] %v1482_v5  ;;  %v1506_v17 = vld [vmem:[#allocation8 + $0x88] sm:$0xff]  ;;  %v1508_v18 = vld [vmem:[#allocation8 + $0x90] sm:$0xff]  ;;  %v1510_v19 = vld [vmem:[#allocation8 + $0x98] sm:$0xff] }
  0x24   :  { %2286 = vst [vmem:[#allocation28_spill] sm:$0xff] %v1484_v6  ;;  %v1512_v20 = vld [vmem:[#allocation8 + $0xa0] sm:$0xff]  ;;  %v1514_v21 = vld [vmem:[#allocation8 + $0xa8] sm:$0xff]  ;;  %v1516_v22 = vld [vmem:[#allocation8 + $0xb0] sm:$0xff] }
  0x25   :  { %2287 = vst [vmem:[#allocation29_spill] sm:$0xff] %v1486_v7  ;;  %v1518_v23 = vld [vmem:[#allocation8 + $0xb8] sm:$0xff]  ;;  %v1520_v24 = vld [vmem:[#allocation8 + $0xc0] sm:$0xff]  ;;  %v1522_v25 = vld [vmem:[#allocation8 + $0xc8] sm:$0xff] }
  0x26   :  { %2288 = vst [vmem:[#allocation30_spill] sm:$0xff] %v1488_v8  ;;  %v1524_v26 = vld [vmem:[#allocation8 + $0xd0] sm:$0xff]  ;;  %v1526_v27 = vld [vmem:[#allocation8 + $0xd8] sm:$0xff]  ;;  %v1528_v28 = vld [vmem:[#allocation8 + $0xe0] sm:$0xff] }
  0x27   :  { %2289 = vst [vmem:[#allocation31_spill] sm:$0xff] %v1490_v9  ;;  %v1530_v29 = vld [vmem:[#allocation8 + $0xe8] sm:$0xff]  ;;  %v1532_v30 = vld [vmem:[#allocation8 + $0xf0] sm:$0xff]  ;;  %v1534_v31 = vld [vmem:[#allocation8 + $0xf8] sm:$0xff] }
  0x28   :  { %2290 = vst [vmem:[#allocation32_spill] sm:$0xff] %v1492_v10  ;;  %v1536_v32 = vld [vmem:[#allocation8 + $0x100] sm:$0xff]  ;;  %v1538_v33 = vld [vmem:[#allocation8 + $0x108] sm:$0xff]  ;;  %v1540_v34 = vld [vmem:[#allocation8 + $0x110] sm:$0xff] }
  0x29   :  { %v1542_v35 = vld [vmem:[#allocation8 + $0x118] sm:$0xff]  ;;  %v1544_v36 = vld [vmem:[#allocation8 + $0x120] sm:$0xff]  ;;  %v1546_v37 = vld [vmem:[#allocation8 + $0x128] sm:$0xff] }
  0x2a   :  { %v1548_v38 = vld [vmem:[#allocation8 + $0x130] sm:$0xff]  ;;  %v1550_v39 = vld [vmem:[#allocation8 + $0x138] sm:$0xff]  ;;  %v1552_v40 = vld [vmem:[#allocation8 + $0x140] sm:$0xff] }
  0x2b   :  { %v1554_v41 = vld [vmem:[#allocation8 + $0x148] sm:$0xff]  ;;  %v1556_v42 = vld [vmem:[#allocation8 + $0x150] sm:$0xff]  ;;  %v1558_v43 = vld [vmem:[#allocation8 + $0x158] sm:$0xff] }
  0x2c   :  { %v1560_v44 = vld [vmem:[#allocation8 + $0x160] sm:$0xff]  ;;  %v1562_v45 = vld [vmem:[#allocation8 + $0x168] sm:$0xff]  ;;  %v1564_v46 = vld [vmem:[#allocation8 + $0x170] sm:$0xff] }
  0x2d   :  { %v1566_v47 = vld [vmem:[#allocation8 + $0x178] sm:$0xff]  ;;  %v1571_v48 = vld [vmem:[%s2217_s5] sm:$0x7]  ;;  %v185_v50 = vld [vmem:[#allocation5 + $0x160] sm:$0xff] }
  0x2e   :  { %v188_v49 = vld [vmem:[#allocation5 + $0x178] sm:$0xff]  ;;  %v186_v51 = vld [vmem:[#allocation5 + $0x168] sm:$0xff]  ;;  %v187_v52 = vld [vmem:[#allocation5 + $0x170] sm:$0xff] }
  0x2f   :  { %237 = vmatpush.msra.mxu2 %v188_v49  ;;  %v182_v53 = vld [vmem:[#allocation5 + $0x148] sm:$0xff]  ;;  %197 = vmatpush.msra.mxu0 %v186_v51  ;;  %v183_v54 = vld [vmem:[#allocation5 + $0x150] sm:$0xff]  ;;  %v184_v55 = vld [vmem:[#allocation5 + $0x158] sm:$0xff] }
  0x30   :  { %217 = vmatpush.msra.mxu1 %v187_v52  ;;  %v180_v56 = vld [vmem:[#allocation5 + $0x138] sm:$0xff]  ;;  %v181_v57 = vld [vmem:[#allocation5 + $0x140] sm:$0xff]  ;;  %v179_v58 = vld [vmem:[#allocation5 + $0x130] sm:$0xff] }
  0x31   :  { %238 = vmatpush.msra.mxu2 %v185_v50  ;;  %198 = vmatpush.msra.mxu0 %v183_v54  ;;  %v177_v59 = vld [vmem:[#allocation5 + $0x120] sm:$0xff]  ;;  %v178_v60 = vld [vmem:[#allocation5 + $0x128] sm:$0xff]  ;;  %v176_v61 = vld [vmem:[#allocation5 + $0x118] sm:$0xff] }
  0x32   :  { %218 = vmatpush.msra.mxu1 %v184_v55  ;;  %v174_v62 = vld [vmem:[#allocation5 + $0x108] sm:$0xff]  ;;  %v175_v63 = vld [vmem:[#allocation5 + $0x110] sm:$0xff]  ;;  %v173_v49 = vld [vmem:[#allocation5 + $0x100] sm:$0xff] }
  0x33   :  { %239 = vmatpush.msra.mxu2 %v182_v53  ;;  %199 = vmatpush.msra.mxu0 %v180_v56  ;;  %v171_v51 = vld [vmem:[#allocation5 + $0xf0] sm:$0xff]  ;;  %v172_v50 = vld [vmem:[#allocation5 + $0xf8] sm:$0xff]  ;;  %v170_v52 = vld [vmem:[#allocation5 + $0xe8] sm:$0xff] }
  0x34   :  { %219 = vmatpush.msra.mxu1 %v181_v57  ;;  %v168_v54 = vld [vmem:[#allocation5 + $0xd8] sm:$0xff]  ;;  %v169_v53 = vld [vmem:[#allocation5 + $0xe0] sm:$0xff]  ;;  %v167_v55 = vld [vmem:[#allocation5 + $0xd0] sm:$0xff] }
  0x35   :  { %240 = vmatpush.msra.mxu2 %v179_v58  ;;  %200 = vmatpush.msra.mxu0 %v177_v59  ;;  %v165_v56 = vld [vmem:[#allocation5 + $0xc0] sm:$0xff]  ;;  %v166_v57 = vld [vmem:[#allocation5 + $0xc8] sm:$0xff]  ;;  %v164_v58 = vld [vmem:[#allocation5 + $0xb8] sm:$0xff] }
  0x36   :  { %220 = vmatpush.msra.mxu1 %v178_v60  ;;  %v162_v59 = vld [vmem:[#allocation5 + $0xa8] sm:$0xff]  ;;  %v163_v60 = vld [vmem:[#allocation5 + $0xb0] sm:$0xff] }
  0x37   :  { %241 = vmatpush.msra.mxu2 %v176_v61  ;;  %201 = vmatpush.msra.mxu0 %v174_v62  ;;  %v161_v61 = vld [vmem:[#allocation5 + $0xa0] sm:$0xff]  ;;  %v159_v62 = vld [vmem:[#allocation5 + $0x90] sm:$0xff] }
  0x38   :  { %221 = vmatpush.msra.mxu1 %v175_v63  ;;  %v160_v63 = vld [vmem:[#allocation5 + $0x98] sm:$0xff] }
  0x39   :  { %242 = vmatpush.msra.mxu2 %v173_v49  ;;  %202 = vmatpush.msra.mxu0 %v171_v51  ;;  %v158_v49 = vld [vmem:[#allocation5 + $0x88] sm:$0xff]  ;;  %v156_v51 = vld [vmem:[#allocation5 + $0x78] sm:$0xff] }
  0x3a   :  { %222 = vmatpush.msra.mxu1 %v172_v50  ;;  %v157_v50 = vld [vmem:[#allocation5 + $0x80] sm:$0xff] }
  0x3b   :  { %243 = vmatpush.msra.mxu2 %v170_v52  ;;  %203 = vmatpush.msra.mxu0 %v168_v54  ;;  %v155_v52 = vld [vmem:[#allocation5 + $0x70] sm:$0xff]  ;;  %v153_v54 = vld [vmem:[#allocation5 + $0x60] sm:$0xff] }
  0x3c   :  { %223 = vmatpush.msra.mxu1 %v169_v53  ;;  %v154_v53 = vld [vmem:[#allocation5 + $0x68] sm:$0xff] }
  0x3d   :  { %244 = vmatpush.msra.mxu2 %v167_v55  ;;  %204 = vmatpush.msra.mxu0 %v165_v56  ;;  %v152_v55 = vld [vmem:[#allocation5 + $0x58] sm:$0xff]  ;;  %v150_v56 = vld [vmem:[#allocation5 + $0x48] sm:$0xff] }
  0x3e   :  { %224 = vmatpush.msra.mxu1 %v166_v57  ;;  %v151_v57 = vld [vmem:[#allocation5 + $0x50] sm:$0xff] }
  0x3f   :  { %245 = vmatpush.msra.mxu2 %v164_v58  ;;  %205 = vmatpush.msra.mxu0 %v162_v59  ;;  %v149_v58 = vld [vmem:[#allocation5 + $0x40] sm:$0xff]  ;;  %v147_v59 = vld [vmem:[#allocation5 + $0x30] sm:$0xff] }
  0x40   :  { %225 = vmatpush.msra.mxu1 %v163_v60  ;;  %v148_v60 = vld [vmem:[#allocation5 + $0x38] sm:$0xff] }
  0x41   :  { %246 = vmatpush.msra.mxu2 %v161_v61  ;;  %206 = vmatpush.msra.mxu0 %v159_v62  ;;  %v146_v61 = vld [vmem:[#allocation5 + $0x28] sm:$0xff]  ;;  %v144_v62 = vld [vmem:[#allocation5 + $0x18] sm:$0xff] }
  0x42   :  { %226 = vmatpush.msra.mxu1 %v160_v63  ;;  %v145_v63 = vld [vmem:[#allocation5 + $0x20] sm:$0xff] }
  0x43   :  { %247 = vmatpush.msra.mxu2 %v158_v49  ;;  %207 = vmatpush.msra.mxu0 %v156_v51  ;;  %v143_v49 = vld [vmem:[#allocation5 + $0x10] sm:$0xff]  ;;  %v140_v51 = vld [vmem:[%s2213_s1] sm:$0xff] }
  0x44   :  { %227 = vmatpush.msra.mxu1 %v157_v50  ;;  %v141_v50 = vld [vmem:[#allocation5] sm:$0xff] }
  0x45   :  { %248 = vmatpush.msra.mxu2 %v155_v52  ;;  %208 = vmatpush.msra.mxu0 %v153_v54  ;;  %v142_v52 = vld [vmem:[#allocation5 + $0x8] sm:$0xff] }
  0x46   :  { %228 = vmatpush.msra.mxu1 %v154_v53  ;;  %v189_v54 = vld [vmem:[%s2216_s4] sm:$0x7]  ;;  %s1586_s4 = smov (!%p994_p0), 0  }
  0x47   :  { %249 = vmatpush.msra.mxu2 %v152_v55  ;;  %209 = vmatpush.msra.mxu0 %v150_v56  ;;  %v191_v53 = vperm.slane %v189_v54, 0  ;;  %v192_v55 = vperm.slane %v189_v54, 1 }
  0x48   :  { %229 = vmatpush.msra.mxu1 %v151_v57 }
  0x49   :  { %250 = vmatpush.msra.mxu2 %v149_v58  ;;  %210 = vmatpush.msra.mxu0 %v147_v59 }
  0x4a   :  { %230 = vmatpush.msra.mxu1 %v148_v60  ;;  %v193_v60 = vperm.slane %v189_v54, 2 }
  0x4b   :  { %251 = vmatpush.msra.mxu2 %v146_v61  ;;  %211 = vmatpush.msra.mxu0 %v144_v62 }
  0x4c   :  { %231 = vmatpush.msra.mxu1 %v145_v63  ;;  %v1582_v63 = vmov 0.0  }
  0x4d   :  { %252 = vmatpush.msra.mxu2 %v143_v49  ;;  %212 = vmatpush.msra.mxu0 %v141_v50 }
  0x4e   :  { %253 = vmatmul.f32.vlgmr.msra.gmra.mxu2 %v140_v51  ;;  %232 = vmatpush.msra.mxu1 %v142_v52 }
  0x4f   :  { %213 = vmatmul.f32.vlgmr.msra.gmra.mxu0 %v140_v51  ;;  %233 = vmatmul.f32.vlgmr.msra.gmra.mxu1 %v140_v51 }
  0xcc   :  { %v214_v56 = vpop.f32.mrf.mxu0  ;;  %v234_v58 = vpop.f32.mrf.mxu1 }
  0xcd   :  { %v215_v57 = vadd.f32 %v214_v56, %v191_v53  ;;  %v235_v59 = vadd.f32 %v234_v58, %v192_v55 }
  0xcf   :  { %257 = vst [vmem:[#allocation2] sm:$0xff] %v215_v57 }
  0xd0   :  { %258 = vst [vmem:[#allocation2 + $0x8] sm:$0xff] %v235_v59  ;;  %970 = sbr.rel (%p994_p0) target bundleno = 419 (0x1a3), region = 114 }
  0xd1   :  { %v254_v61 = vpop.f32.mrf.mxu2 }
  0xd2   :  { %v255_v62 = vadd.f32 %v254_v61, %v193_v60 }
  0xd4   :  { %259 = vst [vmem:[#allocation2 + $0x10] sm:$0xff] %v255_v62 }
  0xd5   :  { %v1584_v49 = vmov 0.0  }
  0xd6 LB: > { %333 = vmatpush.msra.mxu0 %v1562_v45  ;;  %353 = vmatpush.msra.mxu1 %v1564_v46  ;;  %v2291_v9 = vld [vmem:[#allocation31_spill] sm:$0xff]  ;;  %v2292_v10 = vld [vmem:[#allocation32_spill] sm:$0xff]  ;;  %v2294_v7 = vld [vmem:[#allocation29_spill] sm:$0xff]  ;;  %s317_s23 = sshra.s32 %s1329_s4, 3  ;;  %s320_s25 = sand.u32 7, %s1329_s4  ;;  %v327_v50 = vperm.slane %v1571_v48, 0  ;;  %s1329_s4 = sphi %s1586_s4, %s313_s4   ;;  %v1325_v49 = vphi %v1584_v49, %v2302_v49  }
  0xd7   : > { %373 = vmatpush.msra.mxu2 %v1566_v47  ;;  %v2293_v6 = vld [vmem:[#allocation28_spill] sm:$0xff]  ;;  %v2295_v8 = vld [vmem:[#allocation30_spill] sm:$0xff]  ;;  %v2296_v3 = vld [vmem:[#allocation25_spill] sm:$0xff]  ;;  %s995_s24 = smul.u32 24, %s317_s23  ;;  %v328_v52 = vperm.slane %v1571_v48, 1  ;;  %s313_s4 = sadd.s32 1, %s1329_s4  }
  0xd8   : > { %334 = vmatpush.msra.mxu0 %v1556_v42  ;;  %354 = vmatpush.msra.mxu1 %v1558_v43  ;;  %v2297_v4 = vld [vmem:[#allocation26_spill] sm:$0xff]  ;;  %v2298_v5 = vld [vmem:[#allocation27_spill] sm:$0xff]  ;;  %v2301_v2 = vld [vmem:[#allocation24_spill] sm:$0xff]  ;;  %p312_p1 = scmp.ge.s32.totalorder %s313_s4, %s2212_s0 }
  0xd9   : > { %374 = vmatpush.msra.mxu2 %v1560_v44  ;;  %v2299_v0 = vld [vmem:[#allocation22_spill] sm:$0xff]  ;;  %v2300_v1 = vld [vmem:[#allocation23_spill] sm:$0xff]  ;;  %s323_s26 = sadd.s32 %s995_s24, %s320_s25 }
  0xda   : > { %335 = vmatpush.msra.mxu0 %v1550_v39  ;;  %355 = vmatpush.msra.mxu1 %v1552_v40  ;;  %s324_s2 = scalar_lea.vmem [#allocation2], %s323_s26 }
  0xdb   : > { %375 = vmatpush.msra.mxu2 %v1554_v41  ;;  %v325_v51 = vld [vmem:[%s324_s2] ss:$8 sm:$0x7] }
  0xdc   : > { %336 = vmatpush.msra.mxu0 %v1544_v36  ;;  %356 = vmatpush.msra.mxu1 %v1546_v37  ;;  %v414_v54 = vrot.slane %v325_v51, 1 }
  0xdd   : > { %376 = vmatpush.msra.mxu2 %v1548_v38 }
  0xde   : > { %337 = vmatpush.msra.mxu0 %v1538_v33  ;;  %357 = vmatpush.msra.mxu1 %v1540_v34 }
  0xdf   : > { %377 = vmatpush.msra.mxu2 %v1542_v35 }
  0xe0   : > { %338 = vmatpush.msra.mxu0 %v1532_v30  ;;  %358 = vmatpush.msra.mxu1 %v1534_v31 }
  0xe1   : > { %378 = vmatpush.msra.mxu2 %v1536_v32 }
  0xe2   : > { %339 = vmatpush.msra.mxu0 %v1526_v27  ;;  %359 = vmatpush.msra.mxu1 %v1528_v28 }
  0xe3   : > { %379 = vmatpush.msra.mxu2 %v1530_v29 }
  0xe4   : > { %340 = vmatpush.msra.mxu0 %v1520_v24  ;;  %360 = vmatpush.msra.mxu1 %v1522_v25 }
  0xe5   : > { %380 = vmatpush.msra.mxu2 %v1524_v26 }
  0xe6   : > { %341 = vmatpush.msra.mxu0 %v1514_v21  ;;  %361 = vmatpush.msra.mxu1 %v1516_v22 }
  0xe7   : > { %381 = vmatpush.msra.mxu2 %v1518_v23 }
  0xe8   : > { %342 = vmatpush.msra.mxu0 %v1508_v18  ;;  %362 = vmatpush.msra.mxu1 %v1510_v19 }
  0xe9   : > { %382 = vmatpush.msra.mxu2 %v1512_v20 }
  0xea   : > { %343 = vmatpush.msra.mxu0 %v1502_v15  ;;  %363 = vmatpush.msra.mxu1 %v1504_v16 }
  0xeb   : > { %383 = vmatpush.msra.mxu2 %v1506_v17 }
  0xec   : > { %344 = vmatpush.msra.mxu0 %v1496_v12  ;;  %364 = vmatpush.msra.mxu1 %v1498_v13 }
  0xed   : > { %384 = vmatpush.msra.mxu2 %v1500_v14 }
  0xee   : > { %345 = vmatpush.msra.mxu0 %v2291_v9  ;;  %365 = vmatpush.msra.mxu1 %v2292_v10 }
  0xef   : > { %385 = vmatpush.msra.mxu2 %v1494_v11 }
  0xf0   : > { %346 = vmatpush.msra.mxu0 %v2293_v6  ;;  %366 = vmatpush.msra.mxu1 %v2294_v7  ;;  %v329_v6 = vperm.slane %v1571_v48, 2 }
  0xf1   : > { %386 = vmatpush.msra.mxu2 %v2295_v8 }
  0xf2   : > { %347 = vmatpush.msra.mxu0 %v2296_v3  ;;  %367 = vmatpush.msra.mxu1 %v2297_v4 }
  0xf3   : > { %387 = vmatpush.msra.mxu2 %v2298_v5 }
  0xf4   : > { %348 = vmatpush.msra.mxu0 %v2299_v0  ;;  %368 = vmatpush.msra.mxu1 %v2300_v1 }
  0xf5   : > { %349 = vmatmul.f32.vlgmr.msra.gmra.mxu0 %v1325_v49  ;;  %369 = vmatmul.f32.vlgmr.msra.gmra.mxu1 %v1325_v49 }
  0xf6   : > { %388 = vmatpush.msra.mxu2 %v2301_v2 }
  0xf7   : > { %389 = vmatmul.f32.vlgmr.msra.gmra.mxu2 %v1325_v49 }
 0x172   : > { %v350_v53 = vpop.f32.mrf.mxu0  ;;  %v370_v55 = vpop.f32.mrf.mxu1 }
 0x173   : > { %v351_v56 = vadd.f32 %v350_v53, %v327_v50  ;;  %v371_v57 = vadd.f32 %v370_v55, %v328_v52 }
 0x175   : > { %v393_v58 = vadd.f32 %v351_v56, %v325_v51  ;;  %v416_v59 = vadd.f32 %v414_v54, %v371_v57 }
 0x177   : > { %v996_v60 = vmul.f32 -1.442695, %v393_v58  ;;  %v997_v61 = vmul.f32 -1.442695, %v416_v59 }
 0x179   : > { %1089 = vpow2.f32 %v996_v60 }
 0x17a   : > { %1091 = vpow2.f32 %v997_v61  ;;  %v390_v53 = vpop.f32.mrf.mxu2 }
 0x17b   : > { %v391_v58 = vadd.f32 %v390_v53, %v329_v6 }
 0x17f   : > { %v1090_v62 = vpop.eup %1089 }
 0x180   : > { %v1092_v63 = vpop.eup %1091  ;;  %v397_v0 = vadd.f32 1.0, %v1090_v62  ;;  %v437_v62 = vrot.slane %v325_v51, 2 }
 0x181   : > { %v420_v1 = vadd.f32 1.0, %v1092_v63 }
 0x182   : > { %1093 = vrcp.f32 %v397_v0  ;;  %v409_v54 = vand.u32 2147483648, %v397_v0  ;;  %v407_v56 = vand.u32 2147483647, %v397_v0  ;;  %vm403_vm1 = vweird.f32 %v397_v0 }
 0x183   : > { %1095 = vrcp.f32 %v420_v1  ;;  %vm426_vm4 = vweird.f32 %v420_v1  ;;  %v430_v8 = vand.u32 2147483647, %v420_v1 }
 0x184   : > { %v410_v60 = vor.u32 1.1754944e-38, %v409_v54  ;;  %vm408_vm3 = vcmp.eq.f32.partialorder %v407_v56, 8.507059e+37 }
 0x185   : > { %vm431_vm7 = vcmp.eq.f32.partialorder %v430_v8, 8.507059e+37 }
 0x188   : > { %v1094_v2 = vpop.eup %1093 }
 0x189   : > { %v1096_v3 = vpop.eup %1095  ;;  %v399_v4 = vmul.f32 %v1094_v2, %v397_v0  ;;  %vm404_vm0 = vweird.f32 %v1094_v2 }
 0x18a   : > { %v422_v5 = vmul.f32 %v1096_v3, %v420_v1  ;;  %vm405_vm2 = vmor %vm403_vm1, %vm404_vm0  ;;  %vm427_vm5 = vweird.f32 %v1096_v3 }
 0x18b   : > { %v400_v50 = vsub.f32 1.0, %v399_v4  ;;  %v432_v4 = vand.u32 2147483648, %v420_v1  ;;  %vm428_vm6 = vmor %vm426_vm4, %vm427_vm5 }
 0x18c   : > { %v423_v52 = vsub.f32 1.0, %v422_v5 }
 0x18d   : > { %v401_v55 = vmul.f32 %v1094_v2, %v400_v50  ;;  %v433_v10 = vor.u32 1.1754944e-38, %v432_v4 }
 0x18e   : > { %v424_v57 = vmul.f32 %v1096_v3, %v423_v52 }
 0x18f   : > { %v402_v59 = vadd.f32 %v1094_v2, %v401_v55 }
 0x190   : > { %v425_v7 = vadd.f32 %v1096_v3, %v424_v57 }
 0x191   : > { %v406_v61 = vsel %vm405_vm2, %v1094_v2, %v402_v59 }
 0x192   : > { %v411_v63 = vsel %vm408_vm3, %v410_v60, %v406_v61  ;;  %v429_v9 = vsel %vm428_vm6, %v1096_v3, %v425_v7 }
 0x193   : > { %v436_v5 = vmul.f32 %v411_v63, %v391_v58  ;;  %v434_v6 = vsel %vm431_vm7, %v433_v10, %v429_v9 }
 0x194   : > { %v441_v0 = vsub.f32 1.0, %v434_v6  ;;  %v443_v2 = vmul.f32 %v1325_v49, %v434_v6 }
 0x195   : > { %v439_v50 = vadd.f32 %v437_v62, %v436_v5 }
 0x197   : > { %1097 = vtanh.f32 %v439_v50 }
 0x19d   : > { %v1098_v52 = vpop.eup %1097 }
 0x19e   : > { %v442_v53 = vmul.f32 %v1098_v52, %v441_v0  ;;  %315 = sbr.rel (!%p312_p1) target bundleno = 214 (0xd6), region = 120 }
 0x1a0   : > { %v444_v51 = vadd.f32 %v443_v2, %v442_v53  }
 0x1a2   : > { %v2302_v49 = vmov %v444_v51  ;;  %v2303_v63 = vmov (%p312_p1), %v444_v51 }
 0x1a3 PF:  { %v1664_v1 = vld [vmem:[#allocation11 + $0x178] sm:$0xff]  ;;  %v1666_v3 = vld [vmem:[#allocation11 + $0x160] sm:$0xff]  ;;  %v1669_v7 = vld [vmem:[#allocation11 + $0x148] sm:$0xff]  ;;  %vm649_vm9 = vcmask 1040384   ;;  %vm651_vm10 = vcmask 1041408   ;;  %v1333_v63 = vphi %v1582_v63, %v2303_v63  }
 0x1a4   :  { %2304 = vst [vmem:[#allocation22_spill] sm:$0xff] %v1664_v1  ;;  %624 = vmatpush.msra.mxu2 %v1664_v1  ;;  %v1671_v8 = vld [vmem:[#allocation11 + $0x170] sm:$0xff]  ;;  %v1673_v9 = vld [vmem:[#allocation10] sm:$0xff]  ;;  %v1678_v11 = vld [vmem:[#allocation10 + $0x8] sm:$0xff] }
 0x1a5   :  { %2305 = vst [vmem:[#allocation23_spill] sm:$0xff] %v1666_v3  ;;  %604 = vmatpush.msra.mxu1 %v1671_v8  ;;  %v1676_v10 = vld [vmem:[#allocation11 + $0x130] sm:$0xff]  ;;  %v1682_v13 = vld [vmem:[#allocation10 + $0x18] sm:$0xff]  ;;  %v1685_v14 = vld [vmem:[#allocation10 + $0x20] sm:$0xff] }
 0x1a6   :  { %2306 = vst [vmem:[#allocation24_spill] sm:$0xff] %v1669_v7  ;;  %v1680_v12 = vld [vmem:[#allocation10 + $0x10] sm:$0xff]  ;;  %625 = vmatpush.msra.mxu2 %v1666_v3  ;;  %v1687_v15 = vld [vmem:[#allocation10 + $0x28] sm:$0xff]  ;;  %v1691_v17 = vld [vmem:[#allocation10 + $0x38] sm:$0xff] }
 0x1a7   :  { %2307 = vst [vmem:[#allocation25_spill] sm:$0xff] %v1671_v8  ;;  %v1689_v16 = vld [vmem:[#allocation10 + $0x30] sm:$0xff]  ;;  %v1693_v18 = vld [vmem:[#allocation10 + $0x40] sm:$0xff]  ;;  %v1695_v19 = vld [vmem:[#allocation10 + $0x48] sm:$0xff] }
 0x1a8   :  { %2308 = vst [vmem:[#allocation26_spill] sm:$0xff] %v1673_v9  ;;  %626 = vmatpush.msra.mxu2 %v1669_v7  ;;  %v1698_v20 = vld [vmem:[#allocation10 + $0x50] sm:$0xff]  ;;  %v1700_v21 = vld [vmem:[#allocation10 + $0x58] sm:$0xff]  ;;  %v1702_v22 = vld [vmem:[#allocation10 + $0x60] sm:$0xff] }
 0x1a9   :  { %2309 = vst [vmem:[#allocation27_spill] sm:$0xff] %v1676_v10  ;;  %v1704_v23 = vld [vmem:[#allocation10 + $0x68] sm:$0xff]  ;;  %v1706_v24 = vld [vmem:[#allocation10 + $0x70] sm:$0xff]  ;;  %v1708_v25 = vld [vmem:[#allocation10 + $0x78] sm:$0xff] }
 0x1aa   :  { %2310 = vst [vmem:[#allocation28_spill] sm:$0xff] %v1678_v11  ;;  %627 = vmatpush.msra.mxu2 %v1676_v10  ;;  %v1711_v26 = vld [vmem:[#allocation11 + $0x168] sm:$0xff]  ;;  %v1713_v27 = vld [vmem:[#allocation13] sm:$0xff]  ;;  %v1717_v29 = vld [vmem:[#allocation13 + $0x10] sm:$0xff] }
 0x1ab   :  { %2311 = vst [vmem:[#allocation29_spill] sm:$0xff] %v1680_v12  ;;  %v1715_v28 = vld [vmem:[#allocation13 + $0x8] sm:$0xff]  ;;  %v1719_v30 = vld [vmem:[#allocation13 + $0x18] sm:$0xff]  ;;  %v1721_v31 = vld [vmem:[#allocation13 + $0x20] sm:$0xff]  ;;  %584 = vmatpush.msra.mxu0 %v1711_v26 }
 0x1ac   :  { %2312 = vst [vmem:[#allocation30_spill] sm:$0xff] %v1682_v13  ;;  %v1724_v32 = vld [vmem:[#allocation13 + $0x28] sm:$0xff]  ;;  %v1726_v33 = vld [vmem:[#allocation13 + $0x30] sm:$0xff]  ;;  %v1728_v34 = vld [vmem:[#allocation13 + $0x38] sm:$0xff] }
 0x1ad   :  { %2313 = vst [vmem:[#allocation31_spill] sm:$0xff] %v1685_v14  ;;  %v1730_v35 = vld [vmem:[#allocation13 + $0x40] sm:$0xff]  ;;  %v1732_v36 = vld [vmem:[#allocation13 + $0x48] sm:$0xff]  ;;  %v1734_v37 = vld [vmem:[#allocation13 + $0x50] sm:$0xff] }
 0x1ae   :  { %2314 = vst [vmem:[#allocation32_spill] sm:$0xff] %v1687_v15  ;;  %v1736_v38 = vld [vmem:[#allocation13 + $0x58] sm:$0xff]  ;;  %v1738_v39 = vld [vmem:[#allocation13 + $0x60] sm:$0xff]  ;;  %v1740_v40 = vld [vmem:[#allocation13 + $0x68] sm:$0xff] }
 0x1af   :  { %2315 = vst [vmem:[#allocation33_spill] sm:$0xff] %v1689_v16  ;;  %v1742_v41 = vld [vmem:[#allocation13 + $0x70] sm:$0xff]  ;;  %v1744_v42 = vld [vmem:[#allocation13 + $0x78] sm:$0xff]  ;;  %v1746_v43 = vld [vmem:[#allocation13 + $0x80] sm:$0xff] }
 0x1b0   :  { %2316 = vst [vmem:[#allocation34_spill] sm:$0xff] %v1691_v17  ;;  %v1748_v44 = vld [vmem:[#allocation13 + $0x88] sm:$0xff]  ;;  %v1750_v45 = vld [vmem:[#allocation13 + $0x90] sm:$0xff]  ;;  %v1752_v46 = vld [vmem:[#allocation13 + $0x98] sm:$0xff] }
 0x1b1   :  { %2317 = vst [vmem:[#allocation35_spill] sm:$0xff] %v1693_v18  ;;  %v1754_v47 = vld [vmem:[#allocation13 + $0xa0] sm:$0xff]  ;;  %v1756_v48 = vld [vmem:[#allocation13 + $0xa8] sm:$0xff]  ;;  %v1758_v49 = vld [vmem:[#allocation13 + $0xb0] sm:$0xff] }
 0x1b2   :  { %2318 = vst [vmem:[#allocation36_spill] sm:$0xff] %v1695_v19  ;;  %v1760_v54 = vld [vmem:[#allocation13 + $0xb8] sm:$0xff]  ;;  %v1762_v55 = vld [vmem:[#allocation13 + $0xc0] sm:$0xff]  ;;  %v1764_v56 = vld [vmem:[#allocation13 + $0xc8] sm:$0xff] }
 0x1b3   :  { %2319 = vst [vmem:[#allocation37_spill] sm:$0xff] %v1698_v20  ;;  %v1766_v57 = vld [vmem:[#allocation13 + $0xd0] sm:$0xff]  ;;  %v1768_v58 = vld [vmem:[#allocation13 + $0xd8] sm:$0xff]  ;;  %v1770_v59 = vld [vmem:[#allocation13 + $0xe0] sm:$0xff] }
 0x1b4   :  { %2320 = vst [vmem:[#allocation38_spill] sm:$0xff] %v1700_v21  ;;  %v1772_v60 = vld [vmem:[#allocation13 + $0xe8] sm:$0xff]  ;;  %v1774_v61 = vld [vmem:[#allocation13 + $0xf0] sm:$0xff]  ;;  %v1776_v62 = vld [vmem:[#allocation13 + $0xf8] sm:$0xff] }
 0x1b5   :  { %2321 = vst [vmem:[#allocation39_spill] sm:$0xff] %v1702_v22  ;;  %v1778_v4 = vld [vmem:[#allocation13 + $0x100] sm:$0xff]  ;;  %v1780_v5 = vld [vmem:[#allocation13 + $0x108] sm:$0xff]  ;;  %v1782_v50 = vld [vmem:[#allocation13 + $0x110] sm:$0xff] }
 0x1b6   :  { %2322 = vst [vmem:[#allocation40_spill] sm:$0xff] %v1704_v23  ;;  %v1784_v6 = vld [vmem:[#allocation13 + $0x118] sm:$0xff]  ;;  %v1786_v0 = vld [vmem:[#allocation13 + $0x120] sm:$0xff]  ;;  %v1788_v52 = vld [vmem:[#allocation13 + $0x128] sm:$0xff] }
 0x1b7   :  { %2323 = vst [vmem:[#allocation41_spill] sm:$0xff] %v1706_v24  ;;  %v1790_v53 = vld [vmem:[#allocation13 + $0x130] sm:$0xff]  ;;  %v1792_v2 = vld [vmem:[#allocation13 + $0x138] sm:$0xff]  ;;  %v1794_v51 = vld [vmem:[#allocation13 + $0x140] sm:$0xff] }
 0x1b8   :  { %2324 = vst [vmem:[#allocation42_spill] sm:$0xff] %v1708_v25  ;;  %v1796_v10 = vld [vmem:[#allocation13 + $0x148] sm:$0xff]  ;;  %v1798_v7 = vld [vmem:[#allocation13 + $0x150] sm:$0xff]  ;;  %v1800_v3 = vld [vmem:[#allocation13 + $0x158] sm:$0xff] }
 0x1b9   :  { %2325 = vst [vmem:[#allocation43_spill] sm:$0xff] %v1711_v26  ;;  %v1802_v1 = vld [vmem:[#allocation13 + $0x160] sm:$0xff]  ;;  %v1804_v9 = vld [vmem:[#allocation13 + $0x168] sm:$0xff]  ;;  %v1806_v11 = vld [vmem:[#allocation13 + $0x170] sm:$0xff] }
 0x1ba   :  { %2326 = vst [vmem:[#allocation44_spill] sm:$0xff] %v1715_v28  ;;  %v1808_v12 = vld [vmem:[#allocation13 + $0x178] sm:$0xff]  ;;  %v1813_v13 = vld [vmem:[%s2222_s10] sm:$0x7]  ;;  %v1815_v14 = vld [vmem:[#allocation14] sm:$0xff] }
 0x1bb   :  { %2327 = vst [vmem:[#allocation45_spill] sm:$0xff] %v1717_v29  ;;  %v1817_v15 = vld [vmem:[#allocation14 + $0x8] sm:$0xff]  ;;  %v1819_v16 = vld [vmem:[#allocation14 + $0x10] sm:$0xff]  ;;  %v1821_v17 = vld [vmem:[#allocation14 + $0x18] sm:$0xff] }
 0x1bc   :  { %2328 = vst [vmem:[#allocation46_spill] sm:$0xff] %v1778_v4  ;;  %v1823_v18 = vld [vmem:[#allocation14 + $0x20] sm:$0xff]  ;;  %v1825_v19 = vld [vmem:[#allocation14 + $0x28] sm:$0xff]  ;;  %v1827_v20 = vld [vmem:[#allocation14 + $0x30] sm:$0xff] }
 0x1bd   :  { %2329 = vst [vmem:[#allocation47_spill] sm:$0xff] %v1780_v5  ;;  %v1829_v21 = vld [vmem:[#allocation14 + $0x38] sm:$0xff]  ;;  %v1831_v22 = vld [vmem:[#allocation14 + $0x40] sm:$0xff]  ;;  %v1833_v23 = vld [vmem:[#allocation14 + $0x48] sm:$0xff] }
 0x1be   :  { %2330 = vst [vmem:[#allocation48_spill] sm:$0xff] %v1784_v6  ;;  %v1835_v24 = vld [vmem:[#allocation14 + $0x50] sm:$0xff] }
 0x1bf   :  { %2331 = vst [vmem:[#allocation49_spill] sm:$0xff] %v1786_v0 }
 0x1c0   :  { %2332 = vst [vmem:[#allocation50_spill] sm:$0xff] %v1792_v2 }
 0x1c1   :  { %2333 = vst [vmem:[#allocation51_spill] sm:$0xff] %v1796_v10 }
 0x1c2   :  { %2334 = vst [vmem:[#allocation52_spill] sm:$0xff] %v1798_v7 }
 0x1c3   :  { %2335 = vst [vmem:[#allocation53_spill] sm:$0xff] %v1800_v3 }
 0x1c4   :  { %2336 = vst [vmem:[#allocation54_spill] sm:$0xff] %v1802_v1 }
 0x1c5   :  { %2337 = vst [vmem:[#allocation55_spill] sm:$0xff] %v1804_v9 }
 0x1c6   :  { %2338 = vst [vmem:[#allocation56_spill] sm:$0xff] %v1806_v11 }
 0x1c7   :  { %2339 = vst [vmem:[#allocation57_spill] sm:$0xff] %v1808_v12 }
 0x1c8   :  { %2340 = vst [vmem:[#allocation58_spill] sm:$0xff] %v1813_v13 }
 0x1c9   :  { %2341 = vst [vmem:[#allocation59_spill] sm:$0xff] %v1815_v14  ;;  %v1837_v14 = vld [vmem:[#allocation14 + $0x58] sm:$0xff] }
 0x1ca   :  { %2342 = vst [vmem:[#allocation60_spill] sm:$0xff] %v1817_v15  ;;  %v1839_v15 = vld [vmem:[#allocation14 + $0x60] sm:$0xff] }
 0x1cb   :  { %2343 = vst [vmem:[#allocation61_spill] sm:$0xff] %v1819_v16  ;;  %v1841_v16 = vld [vmem:[#allocation14 + $0x68] sm:$0xff] }
 0x1cc   :  { %2344 = vst [vmem:[#allocation62_spill] sm:$0xff] %v1821_v17  ;;  %v1843_v17 = vld [vmem:[#allocation14 + $0x70] sm:$0xff] }
 0x1cd   :  { %2345 = vst [vmem:[#allocation63_spill] sm:$0xff] %v1823_v18  ;;  %v1845_v18 = vld [vmem:[#allocation14 + $0x78] sm:$0xff] }
 0x1ce   :  { %2346 = vst [vmem:[#allocation64_spill] sm:$0xff] %v1825_v19  ;;  %v1850_v19 = vld [vmem:[%s2224_s12] sm:$0x1] }
 0x1cf   :  { %2347 = vst [vmem:[#allocation65_spill] sm:$0xff] %v1827_v20  ;;  %v1852_v20 = vld [vmem:[#allocation11 + $0x158] sm:$0xff] }
 0x1d0   :  { %2348 = vst [vmem:[#allocation66_spill] sm:$0xff] %v1829_v21  ;;  %v1854_v21 = vld [vmem:[#allocation11 + $0x118] sm:$0xff]  ;;  %605 = vmatpush.msra.mxu1 %v1852_v20 }
 0x1d1   :  { %2349 = vst [vmem:[#allocation67_spill] sm:$0xff] %v1831_v22  ;;  %628 = vmatpush.msra.mxu2 %v1854_v21  ;;  %v1858_v22 = vld [vmem:[#allocation11 + $0x150] sm:$0xff] }
 0x1d2   :  { %2350 = vst [vmem:[#allocation68_spill] sm:$0xff] %v1833_v23  ;;  %v1860_v23 = vld [vmem:[#allocation11 + $0x140] sm:$0xff]  ;;  %585 = vmatpush.msra.mxu0 %v1858_v22 }
 0x1d3   :  { %2351 = vst [vmem:[#allocation69_spill] sm:$0xff] %v1835_v24  ;;  %v1862_v24 = vld [vmem:[#allocation11 + $0x100] sm:$0xff]  ;;  %606 = vmatpush.msra.mxu1 %v1860_v23 }
 0x1d4   :  { %2352 = vst [vmem:[#allocation70_spill] sm:$0xff] %v1837_v14  ;;  %v1865_v14 = vld [vmem:[#allocation11 + $0x138] sm:$0xff]  ;;  %629 = vmatpush.msra.mxu2 %v1862_v24 }
 0x1d5   :  { %2353 = vst [vmem:[#allocation71_spill] sm:$0xff] %v1839_v15  ;;  %v1867_v15 = vld [vmem:[#allocation11 + $0x128] sm:$0xff]  ;;  %586 = vmatpush.msra.mxu0 %v1865_v14 }
 0x1d6   :  { %2354 = vst [vmem:[#allocation72_spill] sm:$0xff] %v1841_v16  ;;  %v1873_v16 = vld [vmem:[#allocation11 + $0x120] sm:$0xff]  ;;  %607 = vmatpush.msra.mxu1 %v1867_v15 }
 0x1d7   :  { %2355 = vst [vmem:[#allocation73_spill] sm:$0xff] %v1843_v17  ;;  %587 = vmatpush.msra.mxu0 %v1873_v16  ;;  %v1885_v17 = vld [vmem:[#allocation11 + $0xf8] sm:$0xff] }
 0x1d8   :  { %2356 = vst [vmem:[#allocation74_spill] sm:$0xff] %v1845_v18 }
 0x1d9   :  { %2357 = vst [vmem:[#allocation75_spill] sm:$0xff] %v1850_v19  ;;  %v1869_v19 = vld [vmem:[#allocation11 + $0xe8] sm:$0xff] }
 0x1da   :  { %2358 = vst [vmem:[#allocation76_spill] sm:$0xff] %v1852_v20  ;;  %v1878_v20 = vld [vmem:[#allocation11 + $0xd0] sm:$0xff]  ;;  %630 = vmatpush.msra.mxu2 %v1869_v19 }
 0x1db   :  { %2359 = vst [vmem:[#allocation77_spill] sm:$0xff] %v1854_v21  ;;  %v1876_v21 = vld [vmem:[#allocation11 + $0x110] sm:$0xff] }
 0x1dc   :  { %2360 = vst [vmem:[#allocation78_spill] sm:$0xff] %v1858_v22  ;;  %v1882_v22 = vld [vmem:[#allocation11 + $0x108] sm:$0xff]  ;;  %608 = vmatpush.msra.mxu1 %v1876_v21  ;;  %631 = vmatpush.msra.mxu2 %v1878_v20 }
 0x1dd   :  { %2361 = vst [vmem:[#allocation79_spill] sm:$0xff] %v1860_v23  ;;  %v1887_v23 = vld [vmem:[#allocation11 + $0xb8] sm:$0xff]  ;;  %588 = vmatpush.msra.mxu0 %v1882_v22 }
 0x1de   :  { %2362 = vst [vmem:[#allocation80_spill] sm:$0xff] %v1862_v24  ;;  %v1891_v24 = vld [vmem:[#allocation11 + $0xf0] sm:$0xff]  ;;  %609 = vmatpush.msra.mxu1 %v1885_v17  ;;  %632 = vmatpush.msra.mxu2 %v1887_v23 }
 0x1df   :  { %2363 = vst [vmem:[#allocation81_spill] sm:$0xff] %v1865_v14  ;;  %v1894_v14 = vld [vmem:[#allocation11 + $0xe0] sm:$0xff]  ;;  %589 = vmatpush.msra.mxu0 %v1891_v24 }
 0x1e0   :  { %2364 = vst [vmem:[#allocation82_spill] sm:$0xff] %v1867_v15  ;;  %v1896_v15 = vld [vmem:[#allocation11 + $0xa0] sm:$0xff]  ;;  %610 = vmatpush.msra.mxu1 %v1894_v14 }
 0x1e1   :  { %2365 = vst [vmem:[#allocation83_spill] sm:$0xff] %v1869_v19  ;;  %v1900_v19 = vld [vmem:[#allocation11 + $0xd8] sm:$0xff]  ;;  %633 = vmatpush.msra.mxu2 %v1896_v15 }
 0x1e2   :  { %2366 = vst [vmem:[#allocation84_spill] sm:$0xff] %v1873_v16  ;;  %v1903_v16 = vld [vmem:[#allocation11 + $0xc8] sm:$0xff]  ;;  %590 = vmatpush.msra.mxu0 %v1900_v19 }
 0x1e3   :  { %2367 = vst [vmem:[#allocation85_spill] sm:$0xff] %v1876_v21  ;;  %v1905_v21 = vld [vmem:[#allocation11 + $0x88] sm:$0xff]  ;;  %611 = vmatpush.msra.mxu1 %v1903_v16 }
 0x1e4   :  { %2368 = vst [vmem:[#allocation86_spill] sm:$0xff] %v1878_v20  ;;  %v1909_v20 = vld [vmem:[#allocation11 + $0xc0] sm:$0xff]  ;;  %634 = vmatpush.msra.mxu2 %v1905_v21 }
 0x1e5   :  { %2369 = vst [vmem:[#allocation87_spill] sm:$0xff] %v1882_v22  ;;  %v1912_v22 = vld [vmem:[#allocation11 + $0xb0] sm:$0xff]  ;;  %591 = vmatpush.msra.mxu0 %v1909_v20 }
 0x1e6   :  { %2370 = vst [vmem:[#allocation88_spill] sm:$0xff] %v1885_v17  ;;  %v1914_v17 = vld [vmem:[#allocation11 + $0x70] sm:$0xff]  ;;  %612 = vmatpush.msra.mxu1 %v1912_v22 }
 0x1e7   :  { %2371 = vst [vmem:[#allocation89_spill] sm:$0xff] %v1887_v23  ;;  %v1918_v23 = vld [vmem:[#allocation11 + $0xa8] sm:$0xff]  ;;  %635 = vmatpush.msra.mxu2 %v1914_v17 }
 0x1e8   :  { %2372 = vst [vmem:[#allocation90_spill] sm:$0xff] %v1891_v24  ;;  %v1921_v24 = vld [vmem:[#allocation11 + $0x98] sm:$0xff]  ;;  %592 = vmatpush.msra.mxu0 %v1918_v23 }
 0x1e9   :  { %2373 = vst [vmem:[#allocation91_spill] sm:$0xff] %v1894_v14  ;;  %v1923_v14 = vld [vmem:[#allocation11 + $0x58] sm:$0xff]  ;;  %613 = vmatpush.msra.mxu1 %v1921_v24 }
 0x1ea   :  { %2374 = vst [vmem:[#allocation92_spill] sm:$0xff] %v1896_v15  ;;  %v1927_v15 = vld [vmem:[#allocation11 + $0x90] sm:$0xff]  ;;  %636 = vmatpush.msra.mxu2 %v1923_v14 }
 0x1eb   :  { %2375 = vst [vmem:[#allocation93_spill] sm:$0xff] %v1900_v19  ;;  %v1930_v19 = vld [vmem:[#allocation11 + $0x80] sm:$0xff]  ;;  %593 = vmatpush.msra.mxu0 %v1927_v15 }
 0x1ec   :  { %2376 = vst [vmem:[#allocation94_spill] sm:$0xff] %v1903_v16  ;;  %v1932_v16 = vld [vmem:[#allocation11 + $0x40] sm:$0xff]  ;;  %614 = vmatpush.msra.mxu1 %v1930_v19 }
 0x1ed   :  { %2377 = vst [vmem:[#allocation95_spill] sm:$0xff] %v1905_v21  ;;  %v1936_v21 = vld [vmem:[#allocation11 + $0x78] sm:$0xff]  ;;  %637 = vmatpush.msra.mxu2 %v1932_v16 }
 0x1ee   :  { %2378 = vst [vmem:[#allocation96_spill] sm:$0xff] %v1909_v20  ;;  %v1939_v20 = vld [vmem:[#allocation11 + $0x68] sm:$0xff]  ;;  %594 = vmatpush.msra.mxu0 %v1936_v21 }
 0x1ef   :  { %2379 = vst [vmem:[#allocation97_spill] sm:$0xff] %v1912_v22  ;;  %v1941_v22 = vld [vmem:[#allocation11 + $0x28] sm:$0xff]  ;;  %615 = vmatpush.msra.mxu1 %v1939_v20 }
 0x1f0   :  { %2380 = vst [vmem:[#allocation98_spill] sm:$0xff] %v1914_v17  ;;  %v1945_v17 = vld [vmem:[#allocation11 + $0x60] sm:$0xff]  ;;  %638 = vmatpush.msra.mxu2 %v1941_v22 }
 0x1f1   :  { %2381 = vst [vmem:[#allocation99_spill] sm:$0xff] %v1918_v23  ;;  %v1948_v23 = vld [vmem:[#allocation11 + $0x50] sm:$0xff]  ;;  %595 = vmatpush.msra.mxu0 %v1945_v17 }
 0x1f2   :  { %2382 = vst [vmem:[#allocation100_spill] sm:$0xff] %v1921_v24  ;;  %v1950_v24 = vld [vmem:[#allocation11 + $0x10] sm:$0xff]  ;;  %616 = vmatpush.msra.mxu1 %v1948_v23 }
 0x1f3   :  { %2383 = vst [vmem:[#allocation101_spill] sm:$0xff] %v1923_v14  ;;  %v1954_v14 = vld [vmem:[#allocation11 + $0x48] sm:$0xff]  ;;  %639 = vmatpush.msra.mxu2 %v1950_v24 }
 0x1f4   :  { %2384 = vst [vmem:[#allocation102_spill] sm:$0xff] %v1927_v15  ;;  %v576_v15 = vld [vmem:[#allocation10 + $0x1] sm:$0x1]  ;;  %596 = vmatpush.msra.mxu0 %v1954_v14 }
 0x1f5   :  { %2385 = vst [vmem:[#allocation103_spill] sm:$0xff] %v1930_v19  ;;  %v1957_v19 = vld [vmem:[#allocation11 + $0x38] sm:$0xff]  ;;  %640 = vmatmul.f32.vlgmr.msra.gmra.mxu2 %v576_v15 }
 0x1f6   :  { %2386 = vst [vmem:[#allocation104_spill] sm:$0xff] %v1932_v16  ;;  %v1961_v16 = vld [vmem:[#allocation11 + $0x30] sm:$0xff]  ;;  %617 = vmatpush.msra.mxu1 %v1957_v19 }
 0x1f7   :  { %2387 = vst [vmem:[#allocation105_spill] sm:$0xff] %v1936_v21  ;;  %v1964_v21 = vld [vmem:[#allocation11 + $0x20] sm:$0xff]  ;;  %597 = vmatpush.msra.mxu0 %v1961_v16 }
 0x1f8   :  { %2388 = vst [vmem:[#allocation106_spill] sm:$0xff] %v1939_v20  ;;  %v1970_v20 = vld [vmem:[#allocation11 + $0x8] sm:$0xff]  ;;  %618 = vmatpush.msra.mxu1 %v1964_v21 }
 0x1f9   :  { %2389 = vst [vmem:[#allocation107_spill] sm:$0xff] %v1941_v22  ;;  %v1967_v22 = vld [vmem:[#allocation11 + $0x18] sm:$0xff] }
 0x1fa   :  { %2390 = vst [vmem:[#allocation108_spill] sm:$0xff] %v1945_v17  ;;  %598 = vmatpush.msra.mxu0 %v1967_v22  ;;  %619 = vmatpush.msra.mxu1 %v1970_v20 }
 0x1fb   :  { %2391 = vst [vmem:[#allocation109_spill] sm:$0xff] %v1948_v23  ;;  %v1973_v23 = vld [vmem:[#allocation11] sm:$0xff]  ;;  %620 = vmatmul.f32.vlgmr.msra.gmra.mxu1 %v576_v15 }
 0x1fc   :  { %2392 = vst [vmem:[#allocation110_spill] sm:$0xff] %v1950_v24  ;;  %599 = vmatpush.msra.mxu0 %v1973_v23  ;;  %v654_v24 = vlaneseq }
 0x1fd   :  { %2393 = vst [vmem:[#allocation111_spill] sm:$0xff] %v1954_v14  ;;  %600 = vmatmul.f32.vlgmr.msra.gmra.mxu0 %v576_v15 }
 0x1fe   :  { %2394 = vst [vmem:[#allocation112_spill] sm:$0xff] %v1957_v19  ;;  %v1978_v19 = vand.u32 127, %v654_v24  ;;  %vm1995_vm11 = vcmp.lt.s32.totalorder %v654_v24, 384 }
 0x1ff   :  { %2395 = vst [vmem:[#allocation113_spill] sm:$0xff] %v1961_v16  ;;  %v1369_v16 = vmov 0  }
 0x200   :  { %2396 = vst [vmem:[#allocation114_spill] sm:$0xff] %v1964_v21  ;;  %vm661_vm8 = vcmp.eq.s32.totalorder %v1978_v19, 0  ;;  %v1984_v21 = vld [vmem:[%s2221_s9] sm:$0x7]  ;;  %s2008_s9 = smov 0  }
 0x201   :  { %2397 = vst [vmem:[#allocation115_spill] sm:$0xff] %v1967_v22  ;;  %v662_v14 = vsel %vm661_vm8, 1, %v1369_v16   ;;  %v2278_v22 = vperm.slane %v1984_v21, 1  ;;  %v2277_v17 = vperm.slane %v1984_v21, 0 }
 0x202   :  { %2398 = vst [vmem:[#allocation116_spill] sm:$0xff] %v1970_v20  ;;  %v2279_v20 = vperm.slane %v1984_v21, 2 }
 0x203   :  { %2399 = vst [vmem:[#allocation117_spill] sm:$0xff] %v1973_v23 }
 0x204   :  { %2400 = vst [vmem:[#allocation118_spill] sm:$0xff] %v1978_v19 }
 0x278   :  { %v621_v23 = vpop.f32.mrf.mxu1  ;;  %v641_v15 = vpop.f32.mrf.mxu2 }
 0x279   :  { %v622_v8 = vadd.f32 %v621_v23, %v2278_v22  ;;  %v642_v19 = vadd.f32 %v641_v15, %v2279_v20 }
 0x27a   :  { %v601_v16 = vpop.f32.mrf.mxu0 }
 0x27b   :  { %v602_v26 = vadd.f32 %v601_v16, %v2277_v17  ;;  %v647_v25 = vrot.slane %v622_v8, 7  ;;  %v648_v18 = vrot.slane %v642_v19, 6 }
 0x27d   :  { %v650_v29 = vsel %vm649_vm9, %v602_v26, %v647_v25 }
 0x27e   :  { %v652_v28 = vsel %vm651_vm10, %v650_v29, %v648_v18 }
 0x27f   :  { %658 = vst.msk [vmem:[#allocation3] sm:$0x7] %vm1995_vm11, %v652_v28 }
 0x280 LB: > { %s2018_s6 = sadd.s32 1, %s1345_s9   ;;  %v2403_v8 = vmov %v1341_v63  ;;  %s1345_s9 = sphi %s2008_s9, %s2508_s9   ;;  %v1341_v63 = vphi %v1333_v63, %v2507_v63   ;;  %v1337_v14 = vphi %v662_v14, %v2506_v14  }
 0x281   : > { %p998_p2 = scmp.le.s32.totalorder %s2018_s6, 0 }
 0x282   : > { %s2025_s15 = smov (!%p998_p2), 0  }
 0x283   : > { %978 = sbr.rel (%p998_p2) target bundleno = 854 (0x356), region = 125 }
 0x288 LB: >> { %v2404_v9 = vld [vmem:[#allocation55_spill] sm:$0xff]  ;;  %v2405_v11 = vld [vmem:[#allocation56_spill] sm:$0xff]  ;;  %v2406_v12 = vld [vmem:[#allocation57_spill] sm:$0xff]  ;;  %s679_s18 = smul.u32 3, %s1353_s15  ;;  %s675_s15 = sadd.s32 1, %s1353_s15   ;;  %s1353_s15 = sphi %s2025_s15, %s675_s15   ;;  %v1349_v63 = vphi %v1341_v63, %v2419_v63  }
 0x289   : >> { %689 = vmatpush.msra.mxu0 %v2404_v9  ;;  %709 = vmatpush.msra.mxu1 %v2405_v11  ;;  %v2407_v7 = vld [vmem:[#allocation52_spill] sm:$0xff]  ;;  %v2408_v3 = vld [vmem:[#allocation53_spill] sm:$0xff]  ;;  %v2409_v1 = vld [vmem:[#allocation54_spill] sm:$0xff]  ;;  %p674_p3 = scmp.ge.s32.totalorder %s675_s15, %s2018_s6 }
 0x28a   : >> { %729 = vmatpush.msra.mxu2 %v2406_v12  ;;  %v2410_v2 = vld [vmem:[#allocation50_spill] sm:$0xff]  ;;  %v2411_v10 = vld [vmem:[#allocation51_spill] sm:$0xff]  ;;  %v2412_v0 = vld [vmem:[#allocation49_spill] sm:$0xff]  ;;  %s680_s19 = scalar_lea.vmem [#allocation3], %s679_s18 }
 0x28b   : >> { %690 = vmatpush.msra.mxu0 %v2407_v7  ;;  %710 = vmatpush.msra.mxu1 %v2408_v3  ;;  %v2413_v5 = vld [vmem:[#allocation47_spill] sm:$0xff]  ;;  %v2414_v6 = vld [vmem:[#allocation48_spill] sm:$0xff]  ;;  %v2415_v4 = vld [vmem:[#allocation46_spill] sm:$0xff] }
 0x28c   : >> { %730 = vmatpush.msra.mxu2 %v2409_v1  ;;  %v2416_v18 = vld [vmem:[#allocation44_spill] sm:$0xff]  ;;  %v2417_v19 = vld [vmem:[#allocation45_spill] sm:$0xff]  ;;  %v681_v23 = vld [vmem:[%s680_s19] sm:$0x7] }
 0x28d   : >> { %691 = vmatpush.msra.mxu0 %v2410_v2  ;;  %711 = vmatpush.msra.mxu1 %v1794_v51  ;;  %v2418_v24 = vld [vmem:[#allocation58_spill] sm:$0xff]  ;;  %v770_v28 = vrot.slane %v681_v23, 1 }
 0x28e   : >> { %731 = vmatpush.msra.mxu2 %v2411_v10  ;;  %v683_v25 = vperm.slane %v2418_v24, 0  ;;  %v684_v26 = vperm.slane %v2418_v24, 1  ;;  %v685_v7 = vperm.slane %v2418_v24, 2 }
 0x28f   : >> { %692 = vmatpush.msra.mxu0 %v2412_v0  ;;  %712 = vmatpush.msra.mxu1 %v1788_v52 }
 0x290   : >> { %732 = vmatpush.msra.mxu2 %v1790_v53 }
 0x291   : >> { %693 = vmatpush.msra.mxu0 %v2413_v5  ;;  %713 = vmatpush.msra.mxu1 %v1782_v50 }
 0x292   : >> { %733 = vmatpush.msra.mxu2 %v2414_v6 }
 0x293   : >> { %694 = vmatpush.msra.mxu0 %v1774_v61  ;;  %714 = vmatpush.msra.mxu1 %v1776_v62 }
 0x294   : >> { %734 = vmatpush.msra.mxu2 %v2415_v4 }
 0x295   : >> { %695 = vmatpush.msra.mxu0 %v1768_v58  ;;  %715 = vmatpush.msra.mxu1 %v1770_v59 }
 0x296   : >> { %735 = vmatpush.msra.mxu2 %v1772_v60 }
 0x297   : >> { %696 = vmatpush.msra.mxu0 %v1762_v55  ;;  %716 = vmatpush.msra.mxu1 %v1764_v56 }
 0x298   : >> { %736 = vmatpush.msra.mxu2 %v1766_v57 }
 0x299   : >> { %697 = vmatpush.msra.mxu0 %v1756_v48  ;;  %717 = vmatpush.msra.mxu1 %v1758_v49 }
 0x29a   : >> { %737 = vmatpush.msra.mxu2 %v1760_v54 }
 0x29b   : >> { %698 = vmatpush.msra.mxu0 %v1750_v45  ;;  %718 = vmatpush.msra.mxu1 %v1752_v46 }
 0x29c   : >> { %738 = vmatpush.msra.mxu2 %v1754_v47 }
 0x29d   : >> { %699 = vmatpush.msra.mxu0 %v1744_v42  ;;  %719 = vmatpush.msra.mxu1 %v1746_v43 }
 0x29e   : >> { %739 = vmatpush.msra.mxu2 %v1748_v44 }
 0x29f   : >> { %700 = vmatpush.msra.mxu0 %v1738_v39  ;;  %720 = vmatpush.msra.mxu1 %v1740_v40 }
 0x2a0   : >> { %740 = vmatpush.msra.mxu2 %v1742_v41 }
 0x2a1   : >> { %701 = vmatpush.msra.mxu0 %v1732_v36  ;;  %721 = vmatpush.msra.mxu1 %v1734_v37 }
 0x2a2   : >> { %741 = vmatpush.msra.mxu2 %v1736_v38 }
 0x2a3   : >> { %702 = vmatpush.msra.mxu0 %v1726_v33  ;;  %722 = vmatpush.msra.mxu1 %v1728_v34 }
 0x2a4   : >> { %742 = vmatpush.msra.mxu2 %v1730_v35 }
 0x2a5   : >> { %703 = vmatpush.msra.mxu0 %v1719_v30  ;;  %723 = vmatpush.msra.mxu1 %v1721_v31 }
 0x2a6   : >> { %743 = vmatpush.msra.mxu2 %v1724_v32 }
 0x2a7   : >> { %704 = vmatpush.msra.mxu0 %v1713_v27  ;;  %724 = vmatpush.msra.mxu1 %v2416_v18 }
 0x2a8   : >> { %705 = vmatmul.f32.vlgmr.msra.gmra.mxu0 %v1349_v63  ;;  %725 = vmatmul.f32.vlgmr.msra.gmra.mxu1 %v1349_v63 }
 0x2a9   : >> { %744 = vmatpush.msra.mxu2 %v2417_v19 }
 0x2aa   : >> { %745 = vmatmul.f32.vlgmr.msra.gmra.mxu2 %v1349_v63 }
 0x325   : >> { %v706_v29 = vpop.f32.mrf.mxu0  ;;  %v726_v15 = vpop.f32.mrf.mxu1 }
 0x326   : >> { %v707_v16 = vadd.f32 %v706_v29, %v683_v25  ;;  %v727_v8 = vadd.f32 %v726_v15, %v684_v26 }
 0x328   : >> { %v749_v18 = vadd.f32 %v707_v16, %v681_v23  ;;  %v772_v17 = vadd.f32 %v770_v28, %v727_v8 }
 0x32a   : >> { %v999_v22 = vmul.f32 -1.442695, %v749_v18  ;;  %v1000_v20 = vmul.f32 -1.442695, %v772_v17  ;;  %v793_v18 = vrot.slane %v681_v23, 2 }
 0x32c   : >> { %1099 = vpow2.f32 %v999_v22 }
 0x32d   : >> { %1101 = vpow2.f32 %v1000_v20  ;;  %v746_v29 = vpop.f32.mrf.mxu2 }
 0x32e   : >> { %v747_v22 = vadd.f32 %v746_v29, %v685_v7 }
 0x332   : >> { %v1100_v19 = vpop.eup %1099 }
 0x333   : >> { %v1102_v0 = vpop.eup %1101  ;;  %v753_v1 = vadd.f32 1.0, %v1100_v19 }
 0x334   : >> { %v776_v2 = vadd.f32 1.0, %v1102_v0 }
 0x335   : >> { %1103 = vrcp.f32 %v753_v1  ;;  %v765_v28 = vand.u32 2147483648, %v753_v1  ;;  %v763_v17 = vand.u32 2147483647, %v753_v1  ;;  %vm759_vm13 = vweird.f32 %v753_v1 }
 0x336   : >> { %1105 = vrcp.f32 %v776_v2  ;;  %vm782_vm0 = vweird.f32 %v776_v2  ;;  %v786_v10 = vand.u32 2147483647, %v776_v2 }
 0x337   : >> { %v766_v0 = vor.u32 1.1754944e-38, %v765_v28  ;;  %vm764_vm15 = vcmp.eq.f32.partialorder %v763_v17, 8.507059e+37 }
 0x338   : >> { %vm787_vm3 = vcmp.eq.f32.partialorder %v786_v10, 8.507059e+37 }
 0x33b   : >> { %v1104_v3 = vpop.eup %1103 }
 0x33c   : >> { %v1106_v4 = vpop.eup %1105  ;;  %v755_v5 = vmul.f32 %v1104_v3, %v753_v1  ;;  %vm760_vm12 = vweird.f32 %v1104_v3 }
 0x33d   : >> { %v778_v6 = vmul.f32 %v1106_v4, %v776_v2  ;;  %vm761_vm14 = vmor %vm759_vm13, %vm760_vm12  ;;  %vm783_vm1 = vweird.f32 %v1106_v4 }
 0x33e   : >> { %v756_v25 = vsub.f32 1.0, %v755_v5  ;;  %v788_v5 = vand.u32 2147483648, %v776_v2  ;;  %vm784_vm2 = vmor %vm782_vm0, %vm783_vm1 }
 0x33f   : >> { %v779_v26 = vsub.f32 1.0, %v778_v6 }
 0x340   : >> { %v757_v15 = vmul.f32 %v1104_v3, %v756_v25  ;;  %v789_v12 = vor.u32 1.1754944e-38, %v788_v5 }
 0x341   : >> { %v780_v20 = vmul.f32 %v1106_v4, %v779_v26 }
 0x342   : >> { %v758_v16 = vadd.f32 %v1104_v3, %v757_v15 }
 0x343   : >> { %v781_v9 = vadd.f32 %v1106_v4, %v780_v20 }
 0x344   : >> { %v762_v8 = vsel %vm761_vm14, %v1104_v3, %v758_v16 }
 0x345   : >> { %v767_v19 = vsel %vm764_vm15, %v766_v0, %v762_v8  ;;  %v785_v11 = vsel %vm784_vm2, %v1106_v4, %v781_v9 }
 0x346   : >> { %v792_v6 = vmul.f32 %v767_v19, %v747_v22  ;;  %v790_v7 = vsel %vm787_vm3, %v789_v12, %v785_v11 }
 0x347   : >> { %v797_v1 = vsub.f32 1.0, %v790_v7  ;;  %v799_v3 = vmul.f32 %v1349_v63, %v790_v7 }
 0x348   : >> { %v795_v25 = vadd.f32 %v793_v18, %v792_v6 }
 0x34a   : >> { %1107 = vtanh.f32 %v795_v25 }
 0x350   : >> { %v1108_v26 = vpop.eup %1107 }
 0x351   : >> { %v798_v29 = vmul.f32 %v1108_v26, %v797_v1  ;;  %677 = sbr.rel (!%p674_p3) target bundleno = 648 (0x288), region = 131 }
 0x353   : >> { %v800_v23 = vadd.f32 %v799_v3, %v798_v29  }
 0x355   : >> { %v2419_v63 = vmov %v800_v23  ;;  %v2420_v8 = vmov (%p674_p3), %v800_v23 }
 0x356 PF: > { %v2421_v9 = vld [vmem:[#allocation74_spill] sm:$0xff]  ;;  %v2423_v10 = vld [vmem:[#allocation43_spill] sm:$0xff]  ;;  %v2424_v11 = vld [vmem:[#allocation25_spill] sm:$0xff]  ;;  %s964_s20 = smul.u32 3, %s1345_s9  ;;  %p665_p4 = scmp.ge.s32.totalorder %s2018_s6, 100   ;;  %v1357_v8 = vphi %v2403_v8, %v2420_v8  }
 0x357   : > { %801 = vmatpush.msra.mxu0 %v2421_v9  ;;  %v2422_v63 = vld [vmem:[#allocation42_spill] sm:$0xff]  ;;  %867 = vmatpush.msra.mxu2 %v2423_v10  ;;  %v2425_v12 = vld [vmem:[#allocation73_spill] sm:$0xff]  ;;  %v2428_v28 = vld [vmem:[#allocation76_spill] sm:$0xff]  ;;  %s2508_s9 = smov %s2018_s6  ;;  %s946_s11 = sshll.u32 (%p665_p4), %s2225_s13, 4  ;;  %s947_s11 = int_to_ptr.hbm [resolvable:$true] %s946_s11 }
 0x358   : > { %847 = vmatpush.msra.mxu1 %v2422_v63  ;;  %887 = vmatpush.msra.mxu3 %v2424_v11  ;;  %v2426_v4 = vld [vmem:[#allocation41_spill] sm:$0xff]  ;;  %v2427_v2 = vld [vmem:[#allocation78_spill] sm:$0xff]  ;;  %v2429_v15 = vld [vmem:[#allocation72_spill] sm:$0xff]  ;;  %s965_s21 = scalar_lea.vmem [#allocation3], %s964_s20  ;;  %s1371_s5 = smov (%p665_p4), [#allocation16]  }
 0x359   : > { %802 = vmatpush.msra.mxu0 %v2425_v12  ;;  %868 = vmatpush.msra.mxu2 %v2427_v2  ;;  %v2430_v17 = vld [vmem:[#allocation40_spill] sm:$0xff]  ;;  %v2431_v20 = vld [vmem:[#allocation81_spill] sm:$0xff]  ;;  %v2432_v22 = vld [vmem:[#allocation79_spill] sm:$0xff]  ;;  %s944_s16 = sshll.u32 (%p665_p4), %s1371_s5, 4  ;;  %s945_s16 = int_to_ptr.vmem [resolvable:$true] %s944_s16 }
 0x35a   : > { %848 = vmatpush.msra.mxu1 %v2426_v4  ;;  %888 = vmatpush.msra.mxu3 %v2428_v28  ;;  %v2433_v16 = vld [vmem:[#allocation71_spill] sm:$0xff]  ;;  %v2435_v18 = vld [vmem:[#allocation84_spill] sm:$0xff]  ;;  %v2436_v19 = vld [vmem:[#allocation82_spill] sm:$0xff] }
 0x35b   : > { %803 = vmatpush.msra.mxu0 %v2429_v15  ;;  %869 = vmatpush.msra.mxu2 %v2431_v20  ;;  %v2434_v0 = vld [vmem:[#allocation39_spill] sm:$0xff]  ;;  %v2437_v5 = vld [vmem:[#allocation70_spill] sm:$0xff]  ;;  %v2440_v7 = vld [vmem:[#allocation85_spill] sm:$0xff] }
 0x35c   : > { %849 = vmatpush.msra.mxu1 %v2430_v17  ;;  %889 = vmatpush.msra.mxu3 %v2432_v22  ;;  %v2438_v6 = vld [vmem:[#allocation38_spill] sm:$0xff]  ;;  %v2439_v25 = vld [vmem:[#allocation87_spill] sm:$0xff]  ;;  %v2441_v1 = vld [vmem:[#allocation69_spill] sm:$0xff] }
 0x35d   : > { %804 = vmatpush.msra.mxu0 %v2433_v16  ;;  %870 = vmatpush.msra.mxu2 %v2435_v18  ;;  %v2442_v26 = vld [vmem:[#allocation37_spill] sm:$0xff]  ;;  %v2443_v29 = vld [vmem:[#allocation90_spill] sm:$0xff]  ;;  %v2444_v3 = vld [vmem:[#allocation88_spill] sm:$0xff] }
 0x35e   : > { %850 = vmatpush.msra.mxu1 %v2434_v0  ;;  %890 = vmatpush.msra.mxu3 %v2436_v19  ;;  %v2445_v23 = vld [vmem:[#allocation68_spill] sm:$0xff]  ;;  %v2447_v63 = vld [vmem:[#allocation93_spill] sm:$0xff]  ;;  %v2448_v10 = vld [vmem:[#allocation91_spill] sm:$0xff] }
 0x35f   : > { %805 = vmatpush.msra.mxu0 %v2437_v5  ;;  %871 = vmatpush.msra.mxu2 %v2439_v25  ;;  %v2446_v9 = vld [vmem:[#allocation36_spill] sm:$0xff]  ;;  %v2449_v11 = vld [vmem:[#allocation67_spill] sm:$0xff]  ;;  %v2452_v2 = vld [vmem:[#allocation94_spill] sm:$0xff] }
 0x360   : > { %851 = vmatpush.msra.mxu1 %v2438_v6  ;;  %891 = vmatpush.msra.mxu3 %v2440_v7  ;;  %v2450_v12 = vld [vmem:[#allocation35_spill] sm:$0xff]  ;;  %v2451_v4 = vld [vmem:[#allocation96_spill] sm:$0xff]  ;;  %v2453_v28 = vld [vmem:[#allocation66_spill] sm:$0xff] }
 0x361   : > { %806 = vmatpush.msra.mxu0 %v2441_v1  ;;  %872 = vmatpush.msra.mxu2 %v2443_v29  ;;  %v2454_v15 = vld [vmem:[#allocation34_spill] sm:$0xff]  ;;  %v2455_v17 = vld [vmem:[#allocation99_spill] sm:$0xff]  ;;  %v2456_v20 = vld [vmem:[#allocation97_spill] sm:$0xff] }
 0x362   : > { %852 = vmatpush.msra.mxu1 %v2442_v26  ;;  %892 = vmatpush.msra.mxu3 %v2444_v3  ;;  %v2457_v22 = vld [vmem:[#allocation65_spill] sm:$0xff]  ;;  %v2459_v0 = vld [vmem:[#allocation102_spill] sm:$0xff]  ;;  %v2460_v18 = vld [vmem:[#allocation100_spill] sm:$0xff] }
 0x363   : > { %807 = vmatpush.msra.mxu0 %v2445_v23  ;;  %873 = vmatpush.msra.mxu2 %v2447_v63  ;;  %v2458_v16 = vld [vmem:[#allocation33_spill] sm:$0xff]  ;;  %v2461_v19 = vld [vmem:[#allocation64_spill] sm:$0xff]  ;;  %v2464_v25 = vld [vmem:[#allocation103_spill] sm:$0xff] }
 0x364   : > { %853 = vmatpush.msra.mxu1 %v2446_v9  ;;  %893 = vmatpush.msra.mxu3 %v2448_v10  ;;  %v2462_v5 = vld [vmem:[#allocation32_spill] sm:$0xff]  ;;  %v2463_v6 = vld [vmem:[#allocation105_spill] sm:$0xff]  ;;  %v2465_v7 = vld [vmem:[#allocation63_spill] sm:$0xff] }
 0x365   : > { %808 = vmatpush.msra.mxu0 %v2449_v11  ;;  %874 = vmatpush.msra.mxu2 %v2451_v4  ;;  %v2466_v1 = vld [vmem:[#allocation31_spill] sm:$0xff]  ;;  %v2467_v26 = vld [vmem:[#allocation108_spill] sm:$0xff]  ;;  %v2468_v29 = vld [vmem:[#allocation106_spill] sm:$0xff] }
 0x366   : > { %854 = vmatpush.msra.mxu1 %v2450_v12  ;;  %894 = vmatpush.msra.mxu3 %v2452_v2  ;;  %v2469_v3 = vld [vmem:[#allocation62_spill] sm:$0xff]  ;;  %v2471_v9 = vld [vmem:[#allocation111_spill] sm:$0xff]  ;;  %v2472_v63 = vld [vmem:[#allocation109_spill] sm:$0xff] }
 0x367   : > { %809 = vmatpush.msra.mxu0 %v2453_v28  ;;  %875 = vmatpush.msra.mxu2 %v2455_v17  ;;  %v2470_v23 = vld [vmem:[#allocation30_spill] sm:$0xff]  ;;  %v2473_v10 = vld [vmem:[#allocation61_spill] sm:$0xff]  ;;  %v2476_v4 = vld [vmem:[#allocation112_spill] sm:$0xff] }
 0x368   : > { %855 = vmatpush.msra.mxu1 %v2454_v15  ;;  %895 = vmatpush.msra.mxu3 %v2456_v20  ;;  %v2474_v11 = vld [vmem:[#allocation29_spill] sm:$0xff]  ;;  %v2477_v2 = vld [vmem:[#allocation60_spill] sm:$0xff]  ;;  %v2479_v15 = vld [vmem:[#allocation115_spill] sm:$0xff] }
 0x369   : > { %810 = vmatpush.msra.mxu0 %v2457_v22  ;;  %876 = vmatpush.msra.mxu2 %v2459_v0  ;;  %v2475_v12 = vld [vmem:[#allocation113_spill] sm:$0xff]  ;;  %v2478_v28 = vld [vmem:[#allocation28_spill] sm:$0xff]  ;;  %v2480_v17 = vld [vmem:[#allocation114_spill] sm:$0xff] }
 0x36a   : > { %856 = vmatpush.msra.mxu1 %v2458_v16  ;;  %896 = vmatpush.msra.mxu3 %v2460_v18  ;;  %v2481_v20 = vld [vmem:[#allocation59_spill] sm:$0xff]  ;;  %v2482_v22 = vld [vmem:[#allocation26_spill] sm:$0xff]  ;;  %v2483_v16 = vld [vmem:[#allocation117_spill] sm:$0xff] }
 0x36b   : > { %811 = vmatpush.msra.mxu0 %v2461_v19  ;;  %877 = vmatpush.msra.mxu2 %v2463_v6  ;;  %v2484_v0 = vld [vmem:[#allocation22_spill] sm:$0xff]  ;;  %v2485_v18 = vld [vmem:[#allocation116_spill] sm:$0xff]  ;;  %v2486_v19 = vld [vmem:[#allocation23_spill] sm:$0xff] }
 0x36c   : > { %857 = vmatpush.msra.mxu1 %v2462_v5  ;;  %897 = vmatpush.msra.mxu3 %v2464_v25  ;;  %v2487_v5 = vld [vmem:[#allocation24_spill] sm:$0xff]  ;;  %v2488_v6 = vld [vmem:[#allocation27_spill] sm:$0xff]  ;;  %v2489_v25 = vld [vmem:[#allocation77_spill] sm:$0xff] }
 0x36d   : > { %812 = vmatpush.msra.mxu0 %v2465_v7  ;;  %878 = vmatpush.msra.mxu2 %v2467_v26  ;;  %v2490_v7 = vld [vmem:[#allocation80_spill] sm:$0xff]  ;;  %v2492_v26 = vld [vmem:[#allocation86_spill] sm:$0xff] }
 0x36e   : > { %858 = vmatpush.msra.mxu1 %v2466_v1  ;;  %898 = vmatpush.msra.mxu3 %v2468_v29  ;;  %v2491_v1 = vld [vmem:[#allocation83_spill] sm:$0xff]  ;;  %v2493_v29 = vld [vmem:[#allocation89_spill] sm:$0xff] }
 0x36f   : > { %813 = vmatpush.msra.mxu0 %v2469_v3  ;;  %879 = vmatpush.msra.mxu2 %v2471_v9  ;;  %v2494_v3 = vld [vmem:[#allocation92_spill] sm:$0xff]  ;;  %v2496_v9 = vld [vmem:[#allocation98_spill] sm:$0xff] }
 0x370   : > { %859 = vmatpush.msra.mxu1 %v2470_v23  ;;  %899 = vmatpush.msra.mxu3 %v2472_v63  ;;  %v2495_v23 = vld [vmem:[#allocation95_spill] sm:$0xff]  ;;  %v2497_v63 = vld [vmem:[#allocation101_spill] sm:$0xff] }
 0x371   : > { %814 = vmatpush.msra.mxu0 %v2473_v10  ;;  %880 = vmatpush.msra.mxu2 %v2475_v12  ;;  %v2498_v10 = vld [vmem:[#allocation104_spill] sm:$0xff]  ;;  %v2500_v12 = vld [vmem:[#allocation110_spill] sm:$0xff] }
 0x372   : > { %860 = vmatpush.msra.mxu1 %v2474_v11  ;;  %900 = vmatpush.msra.mxu3 %v2476_v4  ;;  %v2499_v11 = vld [vmem:[#allocation107_spill] sm:$0xff] }
 0x373   : > { %815 = vmatpush.msra.mxu0 %v2477_v2  ;;  %881 = vmatpush.msra.mxu2 %v2479_v15  ;;  %v2501_v2 = vld [vmem:[#allocation75_spill] sm:$0xff] }
 0x374   : > { %861 = vmatpush.msra.mxu1 %v2478_v28  ;;  %901 = vmatpush.msra.mxu3 %v2480_v17 }
 0x375   : > { %816 = vmatpush.msra.mxu0 %v2481_v20  ;;  %882 = vmatpush.msra.mxu2 %v2483_v16  ;;  %v2502_v20 = vld [vmem:[#allocation118_spill] sm:$0xff] }
 0x376   : > { %862 = vmatpush.msra.mxu1 %v2482_v22  ;;  %817 = vmatmul.f32.vlgmr.msra.gmra.mxu0 %v1357_v8 }
 0x377   : > { %907 = vmatpush.msrb.mxu0 %v2484_v0  ;;  %902 = vmatpush.msra.mxu3 %v2485_v18 }
 0x379   : > { %908 = vmatpush.msrb.mxu0 %v2486_v19 }
 0x37b   : > { %909 = vmatpush.msrb.mxu0 %v2487_v5 }
 0x37d   : > { %910 = vmatpush.msrb.mxu0 %v2488_v6 }
 0x37f   : > { %911 = vmatpush.msrb.mxu0 %v2489_v25 }
 0x381   : > { %912 = vmatpush.msrb.mxu0 %v2490_v7 }
 0x383   : > { %913 = vmatpush.msrb.mxu0 %v2491_v1  ;;  %v841_v1 = vstv %s2018_s6 }
 0x384   : > { %vm842_vm6 = vcmp.eq.s32.totalorder %v2502_v20, %v841_v1 }
 0x385   : > { %914 = vmatpush.msrb.mxu0 %v2492_v26 }
 0x387   : > { %915 = vmatpush.msrb.mxu0 %v2493_v29 }
 0x389   : > { %916 = vmatpush.msrb.mxu0 %v2494_v3 }
 0x38b   : > { %917 = vmatpush.msrb.mxu0 %v2495_v23 }
 0x38d   : > { %918 = vmatpush.msrb.mxu0 %v2496_v9 }
 0x38f   : > { %919 = vmatpush.msrb.mxu0 %v2497_v63  ;;  %v1370_v63 = vmov 1.0  }
 0x391   : > { %920 = vmatpush.msrb.mxu0 %v2498_v10 }
 0x393   : > { %921 = vmatpush.msrb.mxu0 %v2499_v11 }
 0x395   : > { %922 = vmatpush.msrb.mxu0 %v2500_v12  ;;  %v2503_v12 = vperm.slane %v1984_v21, 2 }
 0x3f3   : > { %v818_v4 = vpop.f32.mrf.mxu0 }
 0x3f4   : > { %v819_v28 = vadd.f32 %v818_v4, %v2501_v2 }
 0x3f6   : > { %v821_v15 = vsel %vm649_vm9, %v819_v28, -inf }
 0x3f7   : > { %822 = vmax.xlane.f32.xlu0 %v821_v15  ;;  %v2504_v15 = vperm.slane %v1984_v21, 1 }
 0x46a   : > { %v823_v17 = vpop.xlane.xlu0 %822 }
 0x46b   : > { %vm824_vm4 = vcmp.eq.f32.partialorder %v819_v28, %v823_v17 }
 0x46c   : > { %v825_v22 = vsel %vm824_vm4, %v2502_v20, 128 }
 0x46d   : > { %v826_v16 = vsel %vm649_vm9, %v825_v22, 2147483647 }
 0x46e   : > { %v828_v0 = vshra.s32 %v826_v16, 16  ;;  %v827_v19 = vand.u32 65535, %v826_v16 }
 0x470   : > { %v830_v18 = vcvt.s32.f32 %v828_v0  ;;  %v829_v6 = vcvt.s32.f32 %v827_v19 }
 0x472   : > { %831 = vmin.xlane.f32.xlu0 %v830_v18 }
 0x4e5   : > { %v832_v5 = vpop.xlane.xlu0 %831 }
 0x4e6   : > { %vm833_vm5 = vcmp.eq.f32.partialorder %v830_v18, %v832_v5  ;;  %v838_v7 = vcvt.f32.s32 %v832_v5 }
 0x4e7   : > { %v834_v25 = vsel %vm833_vm5, %v829_v6, inf }
 0x4e8   : > { %835 = vmin.xlane.f32.xlu1 %v834_v25  ;;  %v839_v29 = vshll.u32 %v838_v7, 16 }
 0x55b   : > { %v836_v26 = vpop.xlane.xlu1 %835 }
 0x55c   : > { %v837_v3 = vcvt.f32.s32 %v836_v26 }
 0x55e   : > { %v840_v23 = vadd.s32 %v839_v29, %v837_v3 }
 0x560   : > { %v843_v9 = vsel %vm842_vm6, %v840_v23, %v1337_v14   ;;  %vm844_vm7 = vcmp.eq.s32.totalorder %v2502_v20, %v840_v23  ;;  %v2505_v14 = vperm.slane %v1984_v21, 0 }
 0x561   : > { %1002 = vmatmul.msk.f32.vlgmr.msra.gmra.mxu1 %vm844_vm7, %v1370_v63  ;;  %v2507_v63 = vmov %v1357_v8  ;;  %938 = vst [vmem:[#allocation16] sm:$0x1] (%p665_p4), %v843_v9 }
 0x562   :  { %949 = dma.vmem_to_hbm [thread:$0]  (%p665_p4), %s945_s16, 16, %s947_s11, [#allocation7]  }
 0x5de   : > { %v864_v10 = vpop.f32.mrf.mxu1 }
 0x5df   : > { %883 = vmatmul.f32.vlgmr.msra.gmra.mxu2 %v864_v10  ;;  %903 = vmatmul.f32.vlgmr.msra.gmra.mxu3 %v864_v10 }
 0x5e0   : > { %923 = vmatmul.f32.vlgmr.msrb.gmra.mxu0 %v864_v10 }
 0x65d   : > { %v924_v11 = vpop.f32.mrf.mxu0 }
 0x65e   : > { %v925_v4 = vadd.f32 %v924_v11, %v2503_v12 }
 0x660   : > { %v931_v0 = vrot.slane %v925_v4, 6 }
 0x662   : > { %v884_v2 = vpop.f32.mrf.mxu2  ;;  %v904_v28 = vpop.f32.mrf.mxu3 }
 0x663   : > { %v905_v17 = vadd.f32 %v904_v28, %v2504_v15  ;;  %v885_v22 = vadd.f32 %v884_v2, %v2505_v14  ;;  %v2506_v14 = vmov %v843_v9 }
 0x665   : > { %v930_v16 = vrot.slane %v905_v17, 7  ;;  %667 = sbr.rel (!%p665_p4) target bundleno = 640 (0x280), region = 142 }
 0x667   : > { %v932_v18 = vsel %vm649_vm9, %v885_v22, %v930_v16 }
 0x668   : > { %v933_v19 = vsel %vm651_vm10, %v932_v18, %v931_v0 }
 0x669   : > { %1003 = vst.msk [vmem:[%s965_s21 + $0x3] sm:$0x7] %vm1995_vm11, %v933_v19 }
 0x66a   :  { %1321 = dma.done.wait [#allocation7], 16  }
 0x66b   :  { %1322 = vsyncadd [#allocation7], 4294967280 }
 0x66c   :  { %954 = vsyncpa [#allocation6], 1 }
 0x66d   :  { %955 = vsyncpa [#allocation9], 1 }
 0x66e   :  { %956 = vsyncpa [#allocation12], 1 }
 0x66f   :  { %957 = vsyncpa [#allocation15], 1 }
 0x670   :  { %958 = vsyncpa [#allocation7], 1 }

</bundles_post_ra>
